<compile_context>
chip_gen: v7x
topology: tpu7x:2x2x1
jax: 0.10.0
libtpu: 0.0.40
codegen_flags: <defaults>
</compile_context>

<pallas_src>
import math
from functools import partial

import jax
import jax.numpy as jnp
from jax.experimental import pallas as pl
from jax.experimental.pallas import tpu as pltpu


# ---------------------------------------------------------------------------
# Fused kernel: one batch element per grid step, all layers unrolled inside.
# ---------------------------------------------------------------------------
def _oe_encoder_kernel(src_ref, pe_ref, we_ref, be_ref,
                       ln1g_ref, ln1b_ref, wqkv_ref, bqkv_ref, wo_ref, bo_ref,
                       ln2g_ref, ln2b_ref, w1_ref, b1_ref, w2_ref, b2_ref,
                       lnfg_ref, lnfb_ref, o_ref,
                       *, d_model, n_heads, n_layers, eps):
    dk = d_model // n_heads
    inv_sqrt_dk = 1.0 / math.sqrt(dk)

    def layernorm(x, g, b):
        # matches reference: alpha*(x-mean)/(x.std(unbiased)+eps)+bias
        n = x.shape[-1]
        mean = jnp.mean(x, axis=-1, keepdims=True)
        c = x - mean
        var = jnp.sum(c * c, axis=-1, keepdims=True) * (1.0 / (n - 1))
        inv = pl.reciprocal(jnp.sqrt(var) + eps, approx=False)
        return g * c * inv + b

    # ---- Embed (Linear) fused with positional encoding --------------------
    x = jnp.dot(src_ref[...], we_ref[...],
                preferred_element_type=jnp.float32) + be_ref[...]
    x = x * math.sqrt(d_model) + pe_ref[...]          # pe broadcast over batch

    # ---- Encoder layers (static unroll; weights VMEM-resident) ------------
    for l in range(n_layers):
        # --- self-attention sub-block (pre-norm) ---
        x2 = layernorm(x, ln1g_ref[l], ln1b_ref[l])
        qkv = jnp.dot(x2, wqkv_ref[l],
                      preferred_element_type=jnp.float32) + bqkv_ref[l]
        q = qkv[:, 0:d_model]
        k = qkv[:, d_model:2 * d_model]
        v = qkv[:, 2 * d_model:3 * d_model]

        heads = []
        for h in range(n_heads):                       # static; lane slices only
            sl = slice(h * dk, (h + 1) * dk)
            s = jnp.einsum("qd,kd->qk", q[:, sl], k[:, sl],
                           preferred_element_type=jnp.float32) * inv_sqrt_dk
            m = jnp.max(s, axis=-1, keepdims=True)
            p = jnp.exp(s - m)
            p = p * pl.reciprocal(jnp.sum(p, axis=-1, keepdims=True), approx=True)
            heads.append(jnp.dot(p, v[:, sl],
                                 preferred_element_type=jnp.float32))
        attn = jnp.concatenate(heads, axis=-1)         # (S, d_model), merged in-kernel

        x = x + jnp.dot(attn, wo_ref[l],
                        preferred_element_type=jnp.float32) + bo_ref[l]

        # --- feed-forward sub-block (pre-norm) ---
        x2 = layernorm(x, ln2g_ref[l], ln2b_ref[l])
        hdn = jnp.maximum(
            jnp.dot(x2, w1_ref[l], preferred_element_type=jnp.float32) + b1_ref[l],
            0.0)
        x = x + jnp.dot(hdn, w2_ref[l],
                        preferred_element_type=jnp.float32) + b2_ref[l]
        # TODO(synk): dropout omitted (eval/inference path -> identity)

    # ---- final Norm --------------------------------------------------------
    o_ref[...] = layernorm(x, lnfg_ref[...], lnfb_ref[...])


# ---------------------------------------------------------------------------
# Parameters (deterministic synthetic init, stacked per layer for the fused call)
# ---------------------------------------------------------------------------
def _init_linear(key, fan_in, fan_out):
    kw, kb = jax.random.split(key)
    w = jax.random.normal(kw, (fan_in, fan_out), jnp.float32) / math.sqrt(fan_in)
    b = jax.random.normal(kb, (1, fan_out), jnp.float32) * 0.01
    return w, b


def init_params(key, order_dim, d_model, n_encoders, dim_ff):
    L = n_encoders
    keys = jax.random.split(key, 1 + L)
    we, be = _init_linear(keys[0], order_dim, d_model)
    wqkv, bqkv, wo, bo, w1, b1, w2, b2 = ([] for _ in range(8))
    for l in range(L):
        lk = jax.random.split(keys[1 + l], 6)
        wq, bq = _init_linear(lk[0], d_model, d_model)
        wk, bk = _init_linear(lk[1], d_model, d_model)
        wv, bv = _init_linear(lk[2], d_model, d_model)
        wqkv.append(jnp.concatenate([wq, wk, wv], axis=1))   # fused QKV weight
        bqkv.append(jnp.concatenate([bq, bk, bv], axis=1))
        _wo, _bo = _init_linear(lk[3], d_model, d_model)
        _w1, _b1 = _init_linear(lk[4], d_model, dim_ff)
        _w2, _b2 = _init_linear(lk[5], dim_ff, d_model)
        wo.append(_wo); bo.append(_bo)
        w1.append(_w1); b1.append(_b1)
        w2.append(_w2); b2.append(_b2)
    ones = jnp.ones((L, 1, d_model), jnp.float32)
    zeros = jnp.zeros((L, 1, d_model), jnp.float32)
    return dict(
        we=we, be=be,
        wqkv=jnp.stack(wqkv), bqkv=jnp.stack(bqkv),
        wo=jnp.stack(wo), bo=jnp.stack(bo),
        w1=jnp.stack(w1), b1=jnp.stack(b1),
        w2=jnp.stack(w2), b2=jnp.stack(b2),
        ln1g=ones, ln1b=zeros, ln2g=ones, ln2b=zeros,
        lnfg=jnp.ones((1, d_model), jnp.float32),
        lnfb=jnp.zeros((1, d_model), jnp.float32),
    )


def sinusoidal_pe(seq_len, d_model):
    pos = jnp.arange(seq_len, dtype=jnp.float32)[:, None]
    i = jnp.arange(0, d_model, 2, dtype=jnp.float32)
    div = jnp.exp(-math.log(10000.0) * i / d_model)
    pe = jnp.zeros((seq_len, d_model), jnp.float32)
    pe = pe.at[:, 0::2].set(jnp.sin(pos * div))
    pe = pe.at[:, 1::2].set(jnp.cos(pos * div))
    return pe


# ---------------------------------------------------------------------------
# Forward pass: ONE pallas_call for the whole model.
# ---------------------------------------------------------------------------
def oe_encoder_forward(params, src, *, d_model, n_heads, eps):
    B, S, order_dim = src.shape
    n_layers = params["wqkv"].shape[0]
    pe = sinusoidal_pe(S, d_model)  # (S, d_model), broadcast over batch in-kernel

    kernel = partial(_oe_encoder_kernel, d_model=d_model, n_heads=n_heads,
                     n_layers=n_layers, eps=eps)

    weight_args = (pe, params["we"], params["be"],
                   params["ln1g"], params["ln1b"],
                   params["wqkv"], params["bqkv"],
                   params["wo"], params["bo"],
                   params["ln2g"], params["ln2b"],
                   params["w1"], params["b1"],
                   params["w2"], params["b2"],
                   params["lnfg"], params["lnfb"])

    def _resident(a):  # full array, same block for every grid step (VMEM-resident)
        nd = a.ndim
        return pl.BlockSpec(a.shape, lambda b, nd=nd: (0,) * nd)

    in_specs = ([pl.BlockSpec((None, S, order_dim), lambda b: (b, 0, 0))]
                + [_resident(a) for a in weight_args])

    out = pl.pallas_call(
        kernel,
        out_shape=jax.ShapeDtypeStruct((B, S, d_model), jnp.float32),
        grid=(B,),  # one batch element per program; sharded across TCs on v7x
        in_specs=in_specs,
        out_specs=pl.BlockSpec((None, S, d_model), lambda b: (b, 0, 0)),
        compiler_params=pltpu.CompilerParams(
            dimension_semantics=("parallel",),
        ),
    )(src, *weight_args)
    return out


# ---------------------------------------------------------------------------
if __name__ == "__main__":
    # module hyper-params (small, consistent with the reference forward)
    order_dim, d_model, n_encoders, n_heads, dim_ff = 8, 32, 2, 4, 64
    dropout, eps = 0.0, 1e-6
    B, S = 2, 8  # seq length <= order_dim (PosEncode max length in the reference)

    key = jax.random.PRNGKey(0)
    kp, kx = jax.random.split(key)
    params = init_params(kp, order_dim, d_model, n_encoders, dim_ff)
    src = jax.random.normal(kx, (B, S, order_dim), jnp.float32)

    out = oe_encoder_forward(params, src, d_model=d_model, n_heads=n_heads, eps=eps)
    out = jax.block_until_ready(out)
    assert out.shape == (B, S, d_model) and out.dtype == jnp.float32
    print("KERNEL_OK")
</pallas_src>

<mosaic_0001>
module attributes {stable_mosaic.version = 11 : i64} {
  func.func @_oe_encoder_kernel(%arg0: i32, %arg1: memref<1x8x8xf32, #tpu.memory_space<vmem>>, %arg2: memref<8x32xf32, #tpu.memory_space<vmem>>, %arg3: memref<8x32xf32, #tpu.memory_space<vmem>>, %arg4: memref<1x32xf32, #tpu.memory_space<vmem>>, %arg5: memref<2x1x32xf32, #tpu.memory_space<vmem>>, %arg6: memref<2x1x32xf32, #tpu.memory_space<vmem>>, %arg7: memref<2x32x96xf32, #tpu.memory_space<vmem>>, %arg8: memref<2x1x96xf32, #tpu.memory_space<vmem>>, %arg9: memref<2x32x32xf32, #tpu.memory_space<vmem>>, %arg10: memref<2x1x32xf32, #tpu.memory_space<vmem>>, %arg11: memref<2x1x32xf32, #tpu.memory_space<vmem>>, %arg12: memref<2x1x32xf32, #tpu.memory_space<vmem>>, %arg13: memref<2x32x64xf32, #tpu.memory_space<vmem>>, %arg14: memref<2x1x64xf32, #tpu.memory_space<vmem>>, %arg15: memref<2x64x32xf32, #tpu.memory_space<vmem>>, %arg16: memref<2x1x32xf32, #tpu.memory_space<vmem>>, %arg17: memref<1x32xf32, #tpu.memory_space<vmem>>, %arg18: memref<1x32xf32, #tpu.memory_space<vmem>>, %arg19: memref<1x8x32xf32, #tpu.memory_space<vmem>>) attributes {dimension_semantics = [#tpu.dimension_semantics<parallel>], iteration_bounds = array<i64: 2>, scalar_prefetch = 0 : i64, scratch_operands = 0 : i64, tpu.core_type = #tpu.core_type<tc>, window_params = [{transform_indices = @transform_0, window_bounds = array<i64: 1, 8, 8>}, {pipeline_mode = #tpu.pipeline_mode<synchronous>, transform_indices = @transform_1, window_bounds = array<i64: 8, 32>}, {pipeline_mode = #tpu.pipeline_mode<synchronous>, transform_indices = @transform_2, window_bounds = array<i64: 8, 32>}, {pipeline_mode = #tpu.pipeline_mode<synchronous>, transform_indices = @transform_3, window_bounds = array<i64: 1, 32>}, {pipeline_mode = #tpu.pipeline_mode<synchronous>, transform_indices = @transform_4, window_bounds = array<i64: 2, 1, 32>}, {pipeline_mode = #tpu.pipeline_mode<synchronous>, transform_indices = @transform_5, window_bounds = array<i64: 2, 1, 32>}, {pipeline_mode = #tpu.pipeline_mode<synchronous>, transform_indices = @transform_6, window_bounds = array<i64: 2, 32, 96>}, {pipeline_mode = #tpu.pipeline_mode<synchronous>, transform_indices = @transform_7, window_bounds = array<i64: 2, 1, 96>}, {pipeline_mode = #tpu.pipeline_mode<synchronous>, transform_indices = @transform_8, window_bounds = array<i64: 2, 32, 32>}, {pipeline_mode = #tpu.pipeline_mode<synchronous>, transform_indices = @transform_9, window_bounds = array<i64: 2, 1, 32>}, {pipeline_mode = #tpu.pipeline_mode<synchronous>, transform_indices = @transform_10, window_bounds = array<i64: 2, 1, 32>}, {pipeline_mode = #tpu.pipeline_mode<synchronous>, transform_indices = @transform_11, window_bounds = array<i64: 2, 1, 32>}, {pipeline_mode = #tpu.pipeline_mode<synchronous>, transform_indices = @transform_12, window_bounds = array<i64: 2, 32, 64>}, {pipeline_mode = #tpu.pipeline_mode<synchronous>, transform_indices = @transform_13, window_bounds = array<i64: 2, 1, 64>}, {pipeline_mode = #tpu.pipeline_mode<synchronous>, transform_indices = @transform_14, window_bounds = array<i64: 2, 64, 32>}, {pipeline_mode = #tpu.pipeline_mode<synchronous>, transform_indices = @transform_15, window_bounds = array<i64: 2, 1, 32>}, {pipeline_mode = #tpu.pipeline_mode<synchronous>, transform_indices = @transform_16, window_bounds = array<i64: 1, 32>}, {pipeline_mode = #tpu.pipeline_mode<synchronous>, transform_indices = @transform_17, window_bounds = array<i64: 1, 32>}, {transform_indices = @transform_18, window_bounds = array<i64: 1, 8, 32>}]} {
    %c0 = arith.constant 0 : index
    %c0_0 = arith.constant 0 : index
    %c0_1 = arith.constant 0 : index
    %0 = vector.load %arg1[%c0, %c0_0, %c0_1] : memref<1x8x8xf32, #tpu.memory_space<vmem>>, vector<1x8x8xf32>
    %1 = vector.shape_cast %0 : vector<1x8x8xf32> to vector<8x8xf32>
    %c0_2 = arith.constant 0 : index
    %c0_3 = arith.constant 0 : index
    %2 = vector.load %arg3[%c0_2, %c0_3] : memref<8x32xf32, #tpu.memory_space<vmem>>, vector<8x32xf32>
    %cst = arith.constant dense<0.000000e+00> : vector<8x32xf32>
    %3 = tpu.matmul %1, %2, %cst {dimension_numbers = #tpu.dot_dimension_numbers<[1], [0], [0], [1], [0, 0, 1, 1], [], []>} : vector<8x8xf32>, vector<8x32xf32>, vector<8x32xf32> -> vector<8x32xf32>
    %c0_4 = arith.constant 0 : index
    %c0_5 = arith.constant 0 : index
    %4 = vector.load %arg4[%c0_4, %c0_5] : memref<1x32xf32, #tpu.memory_space<vmem>>, vector<1x32xf32>
    %5 = vector.broadcast %4 : vector<1x32xf32> to vector<8x32xf32>
    %6 = arith.addf %3, %5 : vector<8x32xf32>
    %cst_6 = arith.constant 5.65685415 : f32
    %7 = vector.broadcast %cst_6 : f32 to vector<8x32xf32>
    %8 = arith.mulf %6, %7 : vector<8x32xf32>
    %c0_7 = arith.constant 0 : index
    %c0_8 = arith.constant 0 : index
    %9 = vector.load %arg2[%c0_7, %c0_8] : memref<8x32xf32, #tpu.memory_space<vmem>>, vector<8x32xf32>
    %10 = arith.addf %8, %9 : vector<8x32xf32>
    %c0_9 = arith.constant 0 : index
    %c0_10 = arith.constant 0 : index
    %c0_11 = arith.constant 0 : index
    %11 = vector.load %arg5[%c0_9, %c0_10, %c0_11] : memref<2x1x32xf32, #tpu.memory_space<vmem>>, vector<1x1x32xf32>
    %12 = vector.shape_cast %11 : vector<1x1x32xf32> to vector<1x32xf32>
    %c0_12 = arith.constant 0 : index
    %c0_13 = arith.constant 0 : index
    %c0_14 = arith.constant 0 : index
    %13 = vector.load %arg6[%c0_12, %c0_13, %c0_14] : memref<2x1x32xf32, #tpu.memory_space<vmem>>, vector<1x1x32xf32>
    %14 = vector.shape_cast %13 : vector<1x1x32xf32> to vector<1x32xf32>
    %cst_15 = arith.constant dense<0.000000e+00> : vector<8xf32>
    %15 = vector.multi_reduction <add>, %10, %cst_15 [1] : vector<8x32xf32> to vector<8xf32>
    %16 = vector.shape_cast %15 : vector<8xf32> to vector<8x1xf32>
    %cst_16 = arith.constant 3.200000e+01 : f32
    %17 = vector.broadcast %cst_16 : f32 to vector<8x1xf32>
    %18 = arith.divf %16, %17 : vector<8x1xf32>
    %19 = vector.broadcast %18 : vector<8x1xf32> to vector<8x32xf32>
    %20 = arith.subf %10, %19 : vector<8x32xf32>
    %21 = arith.mulf %20, %20 : vector<8x32xf32>
    %cst_17 = arith.constant dense<0.000000e+00> : vector<8xf32>
    %22 = vector.multi_reduction <add>, %21, %cst_17 [1] : vector<8x32xf32> to vector<8xf32>
    %23 = vector.shape_cast %22 : vector<8xf32> to vector<8x1xf32>
    %cst_18 = arith.constant 0.0322580636 : f32
    %24 = vector.broadcast %cst_18 : f32 to vector<8x1xf32>
    %25 = arith.mulf %23, %24 : vector<8x1xf32>
    %26 = math.sqrt %25 : vector<8x1xf32>
    %cst_19 = arith.constant 9.99999997E-7 : f32
    %27 = vector.broadcast %cst_19 : f32 to vector<8x1xf32>
    %28 = arith.addf %26, %27 : vector<8x1xf32>
    %29 = tpu.reciprocal %28 : vector<8x1xf32> -> vector<8x1xf32>
    %30 = vector.broadcast %12 : vector<1x32xf32> to vector<8x32xf32>
    %31 = arith.mulf %30, %20 : vector<8x32xf32>
    %32 = vector.broadcast %29 : vector<8x1xf32> to vector<8x32xf32>
    %33 = arith.mulf %31, %32 : vector<8x32xf32>
    %34 = vector.broadcast %14 : vector<1x32xf32> to vector<8x32xf32>
    %35 = arith.addf %33, %34 : vector<8x32xf32>
    %c0_20 = arith.constant 0 : index
    %c0_21 = arith.constant 0 : index
    %c0_22 = arith.constant 0 : index
    %36 = vector.load %arg7[%c0_20, %c0_21, %c0_22] : memref<2x32x96xf32, #tpu.memory_space<vmem>>, vector<1x32x96xf32>
    %37 = vector.shape_cast %36 : vector<1x32x96xf32> to vector<32x96xf32>
    %cst_23 = arith.constant dense<0.000000e+00> : vector<8x96xf32>
    %38 = tpu.matmul %35, %37, %cst_23 {dimension_numbers = #tpu.dot_dimension_numbers<[1], [0], [0], [1], [0, 0, 1, 1], [], []>} : vector<8x32xf32>, vector<32x96xf32>, vector<8x96xf32> -> vector<8x96xf32>
    %c0_24 = arith.constant 0 : index
    %c0_25 = arith.constant 0 : index
    %c0_26 = arith.constant 0 : index
    %39 = vector.load %arg8[%c0_24, %c0_25, %c0_26] : memref<2x1x96xf32, #tpu.memory_space<vmem>>, vector<1x1x96xf32>
    %40 = vector.shape_cast %39 : vector<1x1x96xf32> to vector<1x96xf32>
    %41 = vector.broadcast %40 : vector<1x96xf32> to vector<8x96xf32>
    %42 = arith.addf %38, %41 : vector<8x96xf32>
    %43 = vector.extract_strided_slice %42 {offsets = [0, 0], sizes = [8, 32], strides = [1, 1]} : vector<8x96xf32> to vector<8x32xf32>
    %44 = vector.extract_strided_slice %42 {offsets = [0, 32], sizes = [8, 32], strides = [1, 1]} : vector<8x96xf32> to vector<8x32xf32>
    %45 = vector.extract_strided_slice %42 {offsets = [0, 64], sizes = [8, 32], strides = [1, 1]} : vector<8x96xf32> to vector<8x32xf32>
    %46 = vector.extract_strided_slice %43 {offsets = [0, 0], sizes = [8, 8], strides = [1, 1]} : vector<8x32xf32> to vector<8x8xf32>
    %47 = vector.extract_strided_slice %44 {offsets = [0, 0], sizes = [8, 8], strides = [1, 1]} : vector<8x32xf32> to vector<8x8xf32>
    "tpu.trace_start"() <{level = 10 : i32, message = "qd,kd->qk"}> : () -> ()
    %cst_27 = arith.constant dense<0.000000e+00> : vector<8x8xf32>
    %48 = tpu.matmul %46, %47, %cst_27 {dimension_numbers = #tpu.dot_dimension_numbers<[1], [1], [0], [0], [0, 0, 1, 0], [], []>} : vector<8x8xf32>, vector<8x8xf32>, vector<8x8xf32> -> vector<8x8xf32>
    "tpu.trace_stop"() : () -> ()
    %cst_28 = arith.constant 0.353553385 : f32
    %49 = vector.broadcast %cst_28 : f32 to vector<8x8xf32>
    %50 = arith.mulf %48, %49 : vector<8x8xf32>
    %cst_29 = arith.constant dense<0xFF800000> : vector<8xf32>
    %51 = vector.multi_reduction <maximumf>, %50, %cst_29 [1] : vector<8x8xf32> to vector<8xf32>
    %52 = vector.shape_cast %51 : vector<8xf32> to vector<8x1xf32>
    %53 = vector.broadcast %52 : vector<8x1xf32> to vector<8x8xf32>
    %54 = arith.subf %50, %53 : vector<8x8xf32>
    %55 = math.exp %54 : vector<8x8xf32>
    %cst_30 = arith.constant dense<0.000000e+00> : vector<8xf32>
    %56 = vector.multi_reduction <add>, %55, %cst_30 [1] : vector<8x8xf32> to vector<8xf32>
    %57 = vector.shape_cast %56 : vector<8xf32> to vector<8x1xf32>
    %58 = tpu.reciprocal %57 {approx = true} : vector<8x1xf32> -> vector<8x1xf32>
    %59 = vector.broadcast %58 : vector<8x1xf32> to vector<8x8xf32>
    %60 = arith.mulf %55, %59 : vector<8x8xf32>
    %61 = vector.extract_strided_slice %45 {offsets = [0, 0], sizes = [8, 8], strides = [1, 1]} : vector<8x32xf32> to vector<8x8xf32>
    %cst_31 = arith.constant dense<0.000000e+00> : vector<8x8xf32>
    %62 = tpu.matmul %60, %61, %cst_31 {dimension_numbers = #tpu.dot_dimension_numbers<[1], [0], [0], [1], [0, 0, 1, 1], [], []>} : vector<8x8xf32>, vector<8x8xf32>, vector<8x8xf32> -> vector<8x8xf32>
    %63 = vector.extract_strided_slice %43 {offsets = [0, 8], sizes = [8, 8], strides = [1, 1]} : vector<8x32xf32> to vector<8x8xf32>
    %64 = vector.extract_strided_slice %44 {offsets = [0, 8], sizes = [8, 8], strides = [1, 1]} : vector<8x32xf32> to vector<8x8xf32>
    "tpu.trace_start"() <{level = 10 : i32, message = "qd,kd->qk"}> : () -> ()
    %cst_32 = arith.constant dense<0.000000e+00> : vector<8x8xf32>
    %65 = tpu.matmul %63, %64, %cst_32 {dimension_numbers = #tpu.dot_dimension_numbers<[1], [1], [0], [0], [0, 0, 1, 0], [], []>} : vector<8x8xf32>, vector<8x8xf32>, vector<8x8xf32> -> vector<8x8xf32>
    "tpu.trace_stop"() : () -> ()
    %cst_33 = arith.constant 0.353553385 : f32
    %66 = vector.broadcast %cst_33 : f32 to vector<8x8xf32>
    %67 = arith.mulf %65, %66 : vector<8x8xf32>
    %cst_34 = arith.constant dense<0xFF800000> : vector<8xf32>
    %68 = vector.multi_reduction <maximumf>, %67, %cst_34 [1] : vector<8x8xf32> to vector<8xf32>
    %69 = vector.shape_cast %68 : vector<8xf32> to vector<8x1xf32>
    %70 = vector.broadcast %69 : vector<8x1xf32> to vector<8x8xf32>
    %71 = arith.subf %67, %70 : vector<8x8xf32>
    %72 = math.exp %71 : vector<8x8xf32>
    %cst_35 = arith.constant dense<0.000000e+00> : vector<8xf32>
    %73 = vector.multi_reduction <add>, %72, %cst_35 [1] : vector<8x8xf32> to vector<8xf32>
    %74 = vector.shape_cast %73 : vector<8xf32> to vector<8x1xf32>
    %75 = tpu.reciprocal %74 {approx = true} : vector<8x1xf32> -> vector<8x1xf32>
    %76 = vector.broadcast %75 : vector<8x1xf32> to vector<8x8xf32>
    %77 = arith.mulf %72, %76 : vector<8x8xf32>
    %78 = vector.extract_strided_slice %45 {offsets = [0, 8], sizes = [8, 8], strides = [1, 1]} : vector<8x32xf32> to vector<8x8xf32>
    %cst_36 = arith.constant dense<0.000000e+00> : vector<8x8xf32>
    %79 = tpu.matmul %77, %78, %cst_36 {dimension_numbers = #tpu.dot_dimension_numbers<[1], [0], [0], [1], [0, 0, 1, 1], [], []>} : vector<8x8xf32>, vector<8x8xf32>, vector<8x8xf32> -> vector<8x8xf32>
    %80 = vector.extract_strided_slice %43 {offsets = [0, 16], sizes = [8, 8], strides = [1, 1]} : vector<8x32xf32> to vector<8x8xf32>
    %81 = vector.extract_strided_slice %44 {offsets = [0, 16], sizes = [8, 8], strides = [1, 1]} : vector<8x32xf32> to vector<8x8xf32>
    "tpu.trace_start"() <{level = 10 : i32, message = "qd,kd->qk"}> : () -> ()
    %cst_37 = arith.constant dense<0.000000e+00> : vector<8x8xf32>
    %82 = tpu.matmul %80, %81, %cst_37 {dimension_numbers = #tpu.dot_dimension_numbers<[1], [1], [0], [0], [0, 0, 1, 0], [], []>} : vector<8x8xf32>, vector<8x8xf32>, vector<8x8xf32> -> vector<8x8xf32>
    "tpu.trace_stop"() : () -> ()
    %cst_38 = arith.constant 0.353553385 : f32
    %83 = vector.broadcast %cst_38 : f32 to vector<8x8xf32>
    %84 = arith.mulf %82, %83 : vector<8x8xf32>
    %cst_39 = arith.constant dense<0xFF800000> : vector<8xf32>
    %85 = vector.multi_reduction <maximumf>, %84, %cst_39 [1] : vector<8x8xf32> to vector<8xf32>
    %86 = vector.shape_cast %85 : vector<8xf32> to vector<8x1xf32>
    %87 = vector.broadcast %86 : vector<8x1xf32> to vector<8x8xf32>
    %88 = arith.subf %84, %87 : vector<8x8xf32>
    %89 = math.exp %88 : vector<8x8xf32>
    %cst_40 = arith.constant dense<0.000000e+00> : vector<8xf32>
    %90 = vector.multi_reduction <add>, %89, %cst_40 [1] : vector<8x8xf32> to vector<8xf32>
    %91 = vector.shape_cast %90 : vector<8xf32> to vector<8x1xf32>
    %92 = tpu.reciprocal %91 {approx = true} : vector<8x1xf32> -> vector<8x1xf32>
    %93 = vector.broadcast %92 : vector<8x1xf32> to vector<8x8xf32>
    %94 = arith.mulf %89, %93 : vector<8x8xf32>
    %95 = vector.extract_strided_slice %45 {offsets = [0, 16], sizes = [8, 8], strides = [1, 1]} : vector<8x32xf32> to vector<8x8xf32>
    %cst_41 = arith.constant dense<0.000000e+00> : vector<8x8xf32>
    %96 = tpu.matmul %94, %95, %cst_41 {dimension_numbers = #tpu.dot_dimension_numbers<[1], [0], [0], [1], [0, 0, 1, 1], [], []>} : vector<8x8xf32>, vector<8x8xf32>, vector<8x8xf32> -> vector<8x8xf32>
    %97 = vector.extract_strided_slice %43 {offsets = [0, 24], sizes = [8, 8], strides = [1, 1]} : vector<8x32xf32> to vector<8x8xf32>
    %98 = vector.extract_strided_slice %44 {offsets = [0, 24], sizes = [8, 8], strides = [1, 1]} : vector<8x32xf32> to vector<8x8xf32>
    "tpu.trace_start"() <{level = 10 : i32, message = "qd,kd->qk"}> : () -> ()
    %cst_42 = arith.constant dense<0.000000e+00> : vector<8x8xf32>
    %99 = tpu.matmul %97, %98, %cst_42 {dimension_numbers = #tpu.dot_dimension_numbers<[1], [1], [0], [0], [0, 0, 1, 0], [], []>} : vector<8x8xf32>, vector<8x8xf32>, vector<8x8xf32> -> vector<8x8xf32>
    "tpu.trace_stop"() : () -> ()
    %cst_43 = arith.constant 0.353553385 : f32
    %100 = vector.broadcast %cst_43 : f32 to vector<8x8xf32>
    %101 = arith.mulf %99, %100 : vector<8x8xf32>
    %cst_44 = arith.constant dense<0xFF800000> : vector<8xf32>
    %102 = vector.multi_reduction <maximumf>, %101, %cst_44 [1] : vector<8x8xf32> to vector<8xf32>
    %103 = vector.shape_cast %102 : vector<8xf32> to vector<8x1xf32>
    %104 = vector.broadcast %103 : vector<8x1xf32> to vector<8x8xf32>
    %105 = arith.subf %101, %104 : vector<8x8xf32>
    %106 = math.exp %105 : vector<8x8xf32>
    %cst_45 = arith.constant dense<0.000000e+00> : vector<8xf32>
    %107 = vector.multi_reduction <add>, %106, %cst_45 [1] : vector<8x8xf32> to vector<8xf32>
    %108 = vector.shape_cast %107 : vector<8xf32> to vector<8x1xf32>
    %109 = tpu.reciprocal %108 {approx = true} : vector<8x1xf32> -> vector<8x1xf32>
    %110 = vector.broadcast %109 : vector<8x1xf32> to vector<8x8xf32>
    %111 = arith.mulf %106, %110 : vector<8x8xf32>
    %112 = vector.extract_strided_slice %45 {offsets = [0, 24], sizes = [8, 8], strides = [1, 1]} : vector<8x32xf32> to vector<8x8xf32>
    %cst_46 = arith.constant dense<0.000000e+00> : vector<8x8xf32>
    %113 = tpu.matmul %111, %112, %cst_46 {dimension_numbers = #tpu.dot_dimension_numbers<[1], [0], [0], [1], [0, 0, 1, 1], [], []>} : vector<8x8xf32>, vector<8x8xf32>, vector<8x8xf32> -> vector<8x8xf32>
    %114 = tpu.concatenate %62, %79, %96, %113 in 1 : vector<8x8xf32>, vector<8x8xf32>, vector<8x8xf32>, vector<8x8xf32> -> vector<8x32xf32>
    %c0_47 = arith.constant 0 : index
    %c0_48 = arith.constant 0 : index
    %c0_49 = arith.constant 0 : index
    %115 = vector.load %arg9[%c0_47, %c0_48, %c0_49] : memref<2x32x32xf32, #tpu.memory_space<vmem>>, vector<1x32x32xf32>
    %116 = vector.shape_cast %115 : vector<1x32x32xf32> to vector<32x32xf32>
    %cst_50 = arith.constant dense<0.000000e+00> : vector<8x32xf32>
    %117 = tpu.matmul %114, %116, %cst_50 {dimension_numbers = #tpu.dot_dimension_numbers<[1], [0], [0], [1], [0, 0, 1, 1], [], []>} : vector<8x32xf32>, vector<32x32xf32>, vector<8x32xf32> -> vector<8x32xf32>
    %118 = arith.addf %10, %117 : vector<8x32xf32>
    %c0_51 = arith.constant 0 : index
    %c0_52 = arith.constant 0 : index
    %c0_53 = arith.constant 0 : index
    %119 = vector.load %arg10[%c0_51, %c0_52, %c0_53] : memref<2x1x32xf32, #tpu.memory_space<vmem>>, vector<1x1x32xf32>
    %120 = vector.shape_cast %119 : vector<1x1x32xf32> to vector<1x32xf32>
    %121 = vector.broadcast %120 : vector<1x32xf32> to vector<8x32xf32>
    %122 = arith.addf %118, %121 : vector<8x32xf32>
    %c0_54 = arith.constant 0 : index
    %c0_55 = arith.constant 0 : index
    %c0_56 = arith.constant 0 : index
    %123 = vector.load %arg11[%c0_54, %c0_55, %c0_56] : memref<2x1x32xf32, #tpu.memory_space<vmem>>, vector<1x1x32xf32>
    %124 = vector.shape_cast %123 : vector<1x1x32xf32> to vector<1x32xf32>
    %c0_57 = arith.constant 0 : index
    %c0_58 = arith.constant 0 : index
    %c0_59 = arith.constant 0 : index
    %125 = vector.load %arg12[%c0_57, %c0_58, %c0_59] : memref<2x1x32xf32, #tpu.memory_space<vmem>>, vector<1x1x32xf32>
    %126 = vector.shape_cast %125 : vector<1x1x32xf32> to vector<1x32xf32>
    %cst_60 = arith.constant dense<0.000000e+00> : vector<8xf32>
    %127 = vector.multi_reduction <add>, %122, %cst_60 [1] : vector<8x32xf32> to vector<8xf32>
    %128 = vector.shape_cast %127 : vector<8xf32> to vector<8x1xf32>
    %cst_61 = arith.constant 3.200000e+01 : f32
    %129 = vector.broadcast %cst_61 : f32 to vector<8x1xf32>
    %130 = arith.divf %128, %129 : vector<8x1xf32>
    %131 = vector.broadcast %130 : vector<8x1xf32> to vector<8x32xf32>
    %132 = arith.subf %122, %131 : vector<8x32xf32>
    %133 = arith.mulf %132, %132 : vector<8x32xf32>
    %cst_62 = arith.constant dense<0.000000e+00> : vector<8xf32>
    %134 = vector.multi_reduction <add>, %133, %cst_62 [1] : vector<8x32xf32> to vector<8xf32>
    %135 = vector.shape_cast %134 : vector<8xf32> to vector<8x1xf32>
    %cst_63 = arith.constant 0.0322580636 : f32
    %136 = vector.broadcast %cst_63 : f32 to vector<8x1xf32>
    %137 = arith.mulf %135, %136 : vector<8x1xf32>
    %138 = math.sqrt %137 : vector<8x1xf32>
    %cst_64 = arith.constant 9.99999997E-7 : f32
    %139 = vector.broadcast %cst_64 : f32 to vector<8x1xf32>
    %140 = arith.addf %138, %139 : vector<8x1xf32>
    %141 = tpu.reciprocal %140 : vector<8x1xf32> -> vector<8x1xf32>
    %142 = vector.broadcast %124 : vector<1x32xf32> to vector<8x32xf32>
    %143 = arith.mulf %142, %132 : vector<8x32xf32>
    %144 = vector.broadcast %141 : vector<8x1xf32> to vector<8x32xf32>
    %145 = arith.mulf %143, %144 : vector<8x32xf32>
    %146 = vector.broadcast %126 : vector<1x32xf32> to vector<8x32xf32>
    %147 = arith.addf %145, %146 : vector<8x32xf32>
    %c0_65 = arith.constant 0 : index
    %c0_66 = arith.constant 0 : index
    %c0_67 = arith.constant 0 : index
    %148 = vector.load %arg13[%c0_65, %c0_66, %c0_67] : memref<2x32x64xf32, #tpu.memory_space<vmem>>, vector<1x32x64xf32>
    %149 = vector.shape_cast %148 : vector<1x32x64xf32> to vector<32x64xf32>
    %cst_68 = arith.constant dense<0.000000e+00> : vector<8x64xf32>
    %150 = tpu.matmul %147, %149, %cst_68 {dimension_numbers = #tpu.dot_dimension_numbers<[1], [0], [0], [1], [0, 0, 1, 1], [], []>} : vector<8x32xf32>, vector<32x64xf32>, vector<8x64xf32> -> vector<8x64xf32>
    %c0_69 = arith.constant 0 : index
    %c0_70 = arith.constant 0 : index
    %c0_71 = arith.constant 0 : index
    %151 = vector.load %arg14[%c0_69, %c0_70, %c0_71] : memref<2x1x64xf32, #tpu.memory_space<vmem>>, vector<1x1x64xf32>
    %152 = vector.shape_cast %151 : vector<1x1x64xf32> to vector<1x64xf32>
    %153 = vector.broadcast %152 : vector<1x64xf32> to vector<8x64xf32>
    %154 = arith.addf %150, %153 : vector<8x64xf32>
    %cst_72 = arith.constant 0.000000e+00 : f32
    %155 = vector.broadcast %cst_72 : f32 to vector<8x64xf32>
    %156 = arith.maximumf %154, %155 : vector<8x64xf32>
    %c0_73 = arith.constant 0 : index
    %c0_74 = arith.constant 0 : index
    %c0_75 = arith.constant 0 : index
    %157 = vector.load %arg15[%c0_73, %c0_74, %c0_75] : memref<2x64x32xf32, #tpu.memory_space<vmem>>, vector<1x64x32xf32>
    %158 = vector.shape_cast %157 : vector<1x64x32xf32> to vector<64x32xf32>
    %cst_76 = arith.constant dense<0.000000e+00> : vector<8x32xf32>
    %159 = tpu.matmul %156, %158, %cst_76 {dimension_numbers = #tpu.dot_dimension_numbers<[1], [0], [0], [1], [0, 0, 1, 1], [], []>} : vector<8x64xf32>, vector<64x32xf32>, vector<8x32xf32> -> vector<8x32xf32>
    %160 = arith.addf %122, %159 : vector<8x32xf32>
    %c0_77 = arith.constant 0 : index
    %c0_78 = arith.constant 0 : index
    %c0_79 = arith.constant 0 : index
    %161 = vector.load %arg16[%c0_77, %c0_78, %c0_79] : memref<2x1x32xf32, #tpu.memory_space<vmem>>, vector<1x1x32xf32>
    %162 = vector.shape_cast %161 : vector<1x1x32xf32> to vector<1x32xf32>
    %163 = vector.broadcast %162 : vector<1x32xf32> to vector<8x32xf32>
    %164 = arith.addf %160, %163 : vector<8x32xf32>
    %c1 = arith.constant 1 : index
    %c0_80 = arith.constant 0 : index
    %c0_81 = arith.constant 0 : index
    %165 = vector.load %arg5[%c1, %c0_80, %c0_81] : memref<2x1x32xf32, #tpu.memory_space<vmem>>, vector<1x1x32xf32>
    %166 = vector.shape_cast %165 : vector<1x1x32xf32> to vector<1x32xf32>
    %c1_82 = arith.constant 1 : index
    %c0_83 = arith.constant 0 : index
    %c0_84 = arith.constant 0 : index
    %167 = vector.load %arg6[%c1_82, %c0_83, %c0_84] : memref<2x1x32xf32, #tpu.memory_space<vmem>>, vector<1x1x32xf32>
    %168 = vector.shape_cast %167 : vector<1x1x32xf32> to vector<1x32xf32>
    %cst_85 = arith.constant dense<0.000000e+00> : vector<8xf32>
    %169 = vector.multi_reduction <add>, %164, %cst_85 [1] : vector<8x32xf32> to vector<8xf32>
    %170 = vector.shape_cast %169 : vector<8xf32> to vector<8x1xf32>
    %cst_86 = arith.constant 3.200000e+01 : f32
    %171 = vector.broadcast %cst_86 : f32 to vector<8x1xf32>
    %172 = arith.divf %170, %171 : vector<8x1xf32>
    %173 = vector.broadcast %172 : vector<8x1xf32> to vector<8x32xf32>
    %174 = arith.subf %164, %173 : vector<8x32xf32>
    %175 = arith.mulf %174, %174 : vector<8x32xf32>
    %cst_87 = arith.constant dense<0.000000e+00> : vector<8xf32>
    %176 = vector.multi_reduction <add>, %175, %cst_87 [1] : vector<8x32xf32> to vector<8xf32>
    %177 = vector.shape_cast %176 : vector<8xf32> to vector<8x1xf32>
    %cst_88 = arith.constant 0.0322580636 : f32
    %178 = vector.broadcast %cst_88 : f32 to vector<8x1xf32>
    %179 = arith.mulf %177, %178 : vector<8x1xf32>
    %180 = math.sqrt %179 : vector<8x1xf32>
    %cst_89 = arith.constant 9.99999997E-7 : f32
    %181 = vector.broadcast %cst_89 : f32 to vector<8x1xf32>
    %182 = arith.addf %180, %181 : vector<8x1xf32>
    %183 = tpu.reciprocal %182 : vector<8x1xf32> -> vector<8x1xf32>
    %184 = vector.broadcast %166 : vector<1x32xf32> to vector<8x32xf32>
    %185 = arith.mulf %184, %174 : vector<8x32xf32>
    %186 = vector.broadcast %183 : vector<8x1xf32> to vector<8x32xf32>
    %187 = arith.mulf %185, %186 : vector<8x32xf32>
    %188 = vector.broadcast %168 : vector<1x32xf32> to vector<8x32xf32>
    %189 = arith.addf %187, %188 : vector<8x32xf32>
    %c1_90 = arith.constant 1 : index
    %c0_91 = arith.constant 0 : index
    %c0_92 = arith.constant 0 : index
    %190 = vector.load %arg7[%c1_90, %c0_91, %c0_92] : memref<2x32x96xf32, #tpu.memory_space<vmem>>, vector<1x32x96xf32>
    %191 = vector.shape_cast %190 : vector<1x32x96xf32> to vector<32x96xf32>
    %cst_93 = arith.constant dense<0.000000e+00> : vector<8x96xf32>
    %192 = tpu.matmul %189, %191, %cst_93 {dimension_numbers = #tpu.dot_dimension_numbers<[1], [0], [0], [1], [0, 0, 1, 1], [], []>} : vector<8x32xf32>, vector<32x96xf32>, vector<8x96xf32> -> vector<8x96xf32>
    %c1_94 = arith.constant 1 : index
    %c0_95 = arith.constant 0 : index
    %c0_96 = arith.constant 0 : index
    %193 = vector.load %arg8[%c1_94, %c0_95, %c0_96] : memref<2x1x96xf32, #tpu.memory_space<vmem>>, vector<1x1x96xf32>
    %194 = vector.shape_cast %193 : vector<1x1x96xf32> to vector<1x96xf32>
    %195 = vector.broadcast %194 : vector<1x96xf32> to vector<8x96xf32>
    %196 = arith.addf %192, %195 : vector<8x96xf32>
    %197 = vector.extract_strided_slice %196 {offsets = [0, 0], sizes = [8, 32], strides = [1, 1]} : vector<8x96xf32> to vector<8x32xf32>
    %198 = vector.extract_strided_slice %196 {offsets = [0, 32], sizes = [8, 32], strides = [1, 1]} : vector<8x96xf32> to vector<8x32xf32>
    %199 = vector.extract_strided_slice %196 {offsets = [0, 64], sizes = [8, 32], strides = [1, 1]} : vector<8x96xf32> to vector<8x32xf32>
    %200 = vector.extract_strided_slice %197 {offsets = [0, 0], sizes = [8, 8], strides = [1, 1]} : vector<8x32xf32> to vector<8x8xf32>
    %201 = vector.extract_strided_slice %198 {offsets = [0, 0], sizes = [8, 8], strides = [1, 1]} : vector<8x32xf32> to vector<8x8xf32>
    "tpu.trace_start"() <{level = 10 : i32, message = "qd,kd->qk"}> : () -> ()
    %cst_97 = arith.constant dense<0.000000e+00> : vector<8x8xf32>
    %202 = tpu.matmul %200, %201, %cst_97 {dimension_numbers = #tpu.dot_dimension_numbers<[1], [1], [0], [0], [0, 0, 1, 0], [], []>} : vector<8x8xf32>, vector<8x8xf32>, vector<8x8xf32> -> vector<8x8xf32>
    "tpu.trace_stop"() : () -> ()
    %cst_98 = arith.constant 0.353553385 : f32
    %203 = vector.broadcast %cst_98 : f32 to vector<8x8xf32>
    %204 = arith.mulf %202, %203 : vector<8x8xf32>
    %cst_99 = arith.constant dense<0xFF800000> : vector<8xf32>
    %205 = vector.multi_reduction <maximumf>, %204, %cst_99 [1] : vector<8x8xf32> to vector<8xf32>
    %206 = vector.shape_cast %205 : vector<8xf32> to vector<8x1xf32>
    %207 = vector.broadcast %206 : vector<8x1xf32> to vector<8x8xf32>
    %208 = arith.subf %204, %207 : vector<8x8xf32>
    %209 = math.exp %208 : vector<8x8xf32>
    %cst_100 = arith.constant dense<0.000000e+00> : vector<8xf32>
    %210 = vector.multi_reduction <add>, %209, %cst_100 [1] : vector<8x8xf32> to vector<8xf32>
    %211 = vector.shape_cast %210 : vector<8xf32> to vector<8x1xf32>
    %212 = tpu.reciprocal %211 {approx = true} : vector<8x1xf32> -> vector<8x1xf32>
    %213 = vector.broadcast %212 : vector<8x1xf32> to vector<8x8xf32>
    %214 = arith.mulf %209, %213 : vector<8x8xf32>
    %215 = vector.extract_strided_slice %199 {offsets = [0, 0], sizes = [8, 8], strides = [1, 1]} : vector<8x32xf32> to vector<8x8xf32>
    %cst_101 = arith.constant dense<0.000000e+00> : vector<8x8xf32>
    %216 = tpu.matmul %214, %215, %cst_101 {dimension_numbers = #tpu.dot_dimension_numbers<[1], [0], [0], [1], [0, 0, 1, 1], [], []>} : vector<8x8xf32>, vector<8x8xf32>, vector<8x8xf32> -> vector<8x8xf32>
    %217 = vector.extract_strided_slice %197 {offsets = [0, 8], sizes = [8, 8], strides = [1, 1]} : vector<8x32xf32> to vector<8x8xf32>
    %218 = vector.extract_strided_slice %198 {offsets = [0, 8], sizes = [8, 8], strides = [1, 1]} : vector<8x32xf32> to vector<8x8xf32>
    "tpu.trace_start"() <{level = 10 : i32, message = "qd,kd->qk"}> : () -> ()
    %cst_102 = arith.constant dense<0.000000e+00> : vector<8x8xf32>
    %219 = tpu.matmul %217, %218, %cst_102 {dimension_numbers = #tpu.dot_dimension_numbers<[1], [1], [0], [0], [0, 0, 1, 0], [], []>} : vector<8x8xf32>, vector<8x8xf32>, vector<8x8xf32> -> vector<8x8xf32>
    "tpu.trace_stop"() : () -> ()
    %cst_103 = arith.constant 0.353553385 : f32
    %220 = vector.broadcast %cst_103 : f32 to vector<8x8xf32>
    %221 = arith.mulf %219, %220 : vector<8x8xf32>
    %cst_104 = arith.constant dense<0xFF800000> : vector<8xf32>
    %222 = vector.multi_reduction <maximumf>, %221, %cst_104 [1] : vector<8x8xf32> to vector<8xf32>
    %223 = vector.shape_cast %222 : vector<8xf32> to vector<8x1xf32>
    %224 = vector.broadcast %223 : vector<8x1xf32> to vector<8x8xf32>
    %225 = arith.subf %221, %224 : vector<8x8xf32>
    %226 = math.exp %225 : vector<8x8xf32>
    %cst_105 = arith.constant dense<0.000000e+00> : vector<8xf32>
    %227 = vector.multi_reduction <add>, %226, %cst_105 [1] : vector<8x8xf32> to vector<8xf32>
    %228 = vector.shape_cast %227 : vector<8xf32> to vector<8x1xf32>
    %229 = tpu.reciprocal %228 {approx = true} : vector<8x1xf32> -> vector<8x1xf32>
    %230 = vector.broadcast %229 : vector<8x1xf32> to vector<8x8xf32>
    %231 = arith.mulf %226, %230 : vector<8x8xf32>
    %232 = vector.extract_strided_slice %199 {offsets = [0, 8], sizes = [8, 8], strides = [1, 1]} : vector<8x32xf32> to vector<8x8xf32>
    %cst_106 = arith.constant dense<0.000000e+00> : vector<8x8xf32>
    %233 = tpu.matmul %231, %232, %cst_106 {dimension_numbers = #tpu.dot_dimension_numbers<[1], [0], [0], [1], [0, 0, 1, 1], [], []>} : vector<8x8xf32>, vector<8x8xf32>, vector<8x8xf32> -> vector<8x8xf32>
    %234 = vector.extract_strided_slice %197 {offsets = [0, 16], sizes = [8, 8], strides = [1, 1]} : vector<8x32xf32> to vector<8x8xf32>
    %235 = vector.extract_strided_slice %198 {offsets = [0, 16], sizes = [8, 8], strides = [1, 1]} : vector<8x32xf32> to vector<8x8xf32>
    "tpu.trace_start"() <{level = 10 : i32, message = "qd,kd->qk"}> : () -> ()
    %cst_107 = arith.constant dense<0.000000e+00> : vector<8x8xf32>
    %236 = tpu.matmul %234, %235, %cst_107 {dimension_numbers = #tpu.dot_dimension_numbers<[1], [1], [0], [0], [0, 0, 1, 0], [], []>} : vector<8x8xf32>, vector<8x8xf32>, vector<8x8xf32> -> vector<8x8xf32>
    "tpu.trace_stop"() : () -> ()
    %cst_108 = arith.constant 0.353553385 : f32
    %237 = vector.broadcast %cst_108 : f32 to vector<8x8xf32>
    %238 = arith.mulf %236, %237 : vector<8x8xf32>
    %cst_109 = arith.constant dense<0xFF800000> : vector<8xf32>
    %239 = vector.multi_reduction <maximumf>, %238, %cst_109 [1] : vector<8x8xf32> to vector<8xf32>
    %240 = vector.shape_cast %239 : vector<8xf32> to vector<8x1xf32>
    %241 = vector.broadcast %240 : vector<8x1xf32> to vector<8x8xf32>
    %242 = arith.subf %238, %241 : vector<8x8xf32>
    %243 = math.exp %242 : vector<8x8xf32>
    %cst_110 = arith.constant dense<0.000000e+00> : vector<8xf32>
    %244 = vector.multi_reduction <add>, %243, %cst_110 [1] : vector<8x8xf32> to vector<8xf32>
    %245 = vector.shape_cast %244 : vector<8xf32> to vector<8x1xf32>
    %246 = tpu.reciprocal %245 {approx = true} : vector<8x1xf32> -> vector<8x1xf32>
    %247 = vector.broadcast %246 : vector<8x1xf32> to vector<8x8xf32>
    %248 = arith.mulf %243, %247 : vector<8x8xf32>
    %249 = vector.extract_strided_slice %199 {offsets = [0, 16], sizes = [8, 8], strides = [1, 1]} : vector<8x32xf32> to vector<8x8xf32>
    %cst_111 = arith.constant dense<0.000000e+00> : vector<8x8xf32>
    %250 = tpu.matmul %248, %249, %cst_111 {dimension_numbers = #tpu.dot_dimension_numbers<[1], [0], [0], [1], [0, 0, 1, 1], [], []>} : vector<8x8xf32>, vector<8x8xf32>, vector<8x8xf32> -> vector<8x8xf32>
    %251 = vector.extract_strided_slice %197 {offsets = [0, 24], sizes = [8, 8], strides = [1, 1]} : vector<8x32xf32> to vector<8x8xf32>
    %252 = vector.extract_strided_slice %198 {offsets = [0, 24], sizes = [8, 8], strides = [1, 1]} : vector<8x32xf32> to vector<8x8xf32>
    "tpu.trace_start"() <{level = 10 : i32, message = "qd,kd->qk"}> : () -> ()
    %cst_112 = arith.constant dense<0.000000e+00> : vector<8x8xf32>
    %253 = tpu.matmul %251, %252, %cst_112 {dimension_numbers = #tpu.dot_dimension_numbers<[1], [1], [0], [0], [0, 0, 1, 0], [], []>} : vector<8x8xf32>, vector<8x8xf32>, vector<8x8xf32> -> vector<8x8xf32>
    "tpu.trace_stop"() : () -> ()
    %cst_113 = arith.constant 0.353553385 : f32
    %254 = vector.broadcast %cst_113 : f32 to vector<8x8xf32>
    %255 = arith.mulf %253, %254 : vector<8x8xf32>
    %cst_114 = arith.constant dense<0xFF800000> : vector<8xf32>
    %256 = vector.multi_reduction <maximumf>, %255, %cst_114 [1] : vector<8x8xf32> to vector<8xf32>
    %257 = vector.shape_cast %256 : vector<8xf32> to vector<8x1xf32>
    %258 = vector.broadcast %257 : vector<8x1xf32> to vector<8x8xf32>
    %259 = arith.subf %255, %258 : vector<8x8xf32>
    %260 = math.exp %259 : vector<8x8xf32>
    %cst_115 = arith.constant dense<0.000000e+00> : vector<8xf32>
    %261 = vector.multi_reduction <add>, %260, %cst_115 [1] : vector<8x8xf32> to vector<8xf32>
    %262 = vector.shape_cast %261 : vector<8xf32> to vector<8x1xf32>
    %263 = tpu.reciprocal %262 {approx = true} : vector<8x1xf32> -> vector<8x1xf32>
    %264 = vector.broadcast %263 : vector<8x1xf32> to vector<8x8xf32>
    %265 = arith.mulf %260, %264 : vector<8x8xf32>
    %266 = vector.extract_strided_slice %199 {offsets = [0, 24], sizes = [8, 8], strides = [1, 1]} : vector<8x32xf32> to vector<8x8xf32>
    %cst_116 = arith.constant dense<0.000000e+00> : vector<8x8xf32>
    %267 = tpu.matmul %265, %266, %cst_116 {dimension_numbers = #tpu.dot_dimension_numbers<[1], [0], [0], [1], [0, 0, 1, 1], [], []>} : vector<8x8xf32>, vector<8x8xf32>, vector<8x8xf32> -> vector<8x8xf32>
    %268 = tpu.concatenate %216, %233, %250, %267 in 1 : vector<8x8xf32>, vector<8x8xf32>, vector<8x8xf32>, vector<8x8xf32> -> vector<8x32xf32>
    %c1_117 = arith.constant 1 : index
    %c0_118 = arith.constant 0 : index
    %c0_119 = arith.constant 0 : index
    %269 = vector.load %arg9[%c1_117, %c0_118, %c0_119] : memref<2x32x32xf32, #tpu.memory_space<vmem>>, vector<1x32x32xf32>
    %270 = vector.shape_cast %269 : vector<1x32x32xf32> to vector<32x32xf32>
    %cst_120 = arith.constant dense<0.000000e+00> : vector<8x32xf32>
    %271 = tpu.matmul %268, %270, %cst_120 {dimension_numbers = #tpu.dot_dimension_numbers<[1], [0], [0], [1], [0, 0, 1, 1], [], []>} : vector<8x32xf32>, vector<32x32xf32>, vector<8x32xf32> -> vector<8x32xf32>
    %272 = arith.addf %164, %271 : vector<8x32xf32>
    %c1_121 = arith.constant 1 : index
    %c0_122 = arith.constant 0 : index
    %c0_123 = arith.constant 0 : index
    %273 = vector.load %arg10[%c1_121, %c0_122, %c0_123] : memref<2x1x32xf32, #tpu.memory_space<vmem>>, vector<1x1x32xf32>
    %274 = vector.shape_cast %273 : vector<1x1x32xf32> to vector<1x32xf32>
    %275 = vector.broadcast %274 : vector<1x32xf32> to vector<8x32xf32>
    %276 = arith.addf %272, %275 : vector<8x32xf32>
    %c1_124 = arith.constant 1 : index
    %c0_125 = arith.constant 0 : index
    %c0_126 = arith.constant 0 : index
    %277 = vector.load %arg11[%c1_124, %c0_125, %c0_126] : memref<2x1x32xf32, #tpu.memory_space<vmem>>, vector<1x1x32xf32>
    %278 = vector.shape_cast %277 : vector<1x1x32xf32> to vector<1x32xf32>
    %c1_127 = arith.constant 1 : index
    %c0_128 = arith.constant 0 : index
    %c0_129 = arith.constant 0 : index
    %279 = vector.load %arg12[%c1_127, %c0_128, %c0_129] : memref<2x1x32xf32, #tpu.memory_space<vmem>>, vector<1x1x32xf32>
    %280 = vector.shape_cast %279 : vector<1x1x32xf32> to vector<1x32xf32>
    %cst_130 = arith.constant dense<0.000000e+00> : vector<8xf32>
    %281 = vector.multi_reduction <add>, %276, %cst_130 [1] : vector<8x32xf32> to vector<8xf32>
    %282 = vector.shape_cast %281 : vector<8xf32> to vector<8x1xf32>
    %cst_131 = arith.constant 3.200000e+01 : f32
    %283 = vector.broadcast %cst_131 : f32 to vector<8x1xf32>
    %284 = arith.divf %282, %283 : vector<8x1xf32>
    %285 = vector.broadcast %284 : vector<8x1xf32> to vector<8x32xf32>
    %286 = arith.subf %276, %285 : vector<8x32xf32>
    %287 = arith.mulf %286, %286 : vector<8x32xf32>
    %cst_132 = arith.constant dense<0.000000e+00> : vector<8xf32>
    %288 = vector.multi_reduction <add>, %287, %cst_132 [1] : vector<8x32xf32> to vector<8xf32>
    %289 = vector.shape_cast %288 : vector<8xf32> to vector<8x1xf32>
    %cst_133 = arith.constant 0.0322580636 : f32
    %290 = vector.broadcast %cst_133 : f32 to vector<8x1xf32>
    %291 = arith.mulf %289, %290 : vector<8x1xf32>
    %292 = math.sqrt %291 : vector<8x1xf32>
    %cst_134 = arith.constant 9.99999997E-7 : f32
    %293 = vector.broadcast %cst_134 : f32 to vector<8x1xf32>
    %294 = arith.addf %292, %293 : vector<8x1xf32>
    %295 = tpu.reciprocal %294 : vector<8x1xf32> -> vector<8x1xf32>
    %296 = vector.broadcast %278 : vector<1x32xf32> to vector<8x32xf32>
    %297 = arith.mulf %296, %286 : vector<8x32xf32>
    %298 = vector.broadcast %295 : vector<8x1xf32> to vector<8x32xf32>
    %299 = arith.mulf %297, %298 : vector<8x32xf32>
    %300 = vector.broadcast %280 : vector<1x32xf32> to vector<8x32xf32>
    %301 = arith.addf %299, %300 : vector<8x32xf32>
    %c1_135 = arith.constant 1 : index
    %c0_136 = arith.constant 0 : index
    %c0_137 = arith.constant 0 : index
    %302 = vector.load %arg13[%c1_135, %c0_136, %c0_137] : memref<2x32x64xf32, #tpu.memory_space<vmem>>, vector<1x32x64xf32>
    %303 = vector.shape_cast %302 : vector<1x32x64xf32> to vector<32x64xf32>
    %cst_138 = arith.constant dense<0.000000e+00> : vector<8x64xf32>
    %304 = tpu.matmul %301, %303, %cst_138 {dimension_numbers = #tpu.dot_dimension_numbers<[1], [0], [0], [1], [0, 0, 1, 1], [], []>} : vector<8x32xf32>, vector<32x64xf32>, vector<8x64xf32> -> vector<8x64xf32>
    %c1_139 = arith.constant 1 : index
    %c0_140 = arith.constant 0 : index
    %c0_141 = arith.constant 0 : index
    %305 = vector.load %arg14[%c1_139, %c0_140, %c0_141] : memref<2x1x64xf32, #tpu.memory_space<vmem>>, vector<1x1x64xf32>
    %306 = vector.shape_cast %305 : vector<1x1x64xf32> to vector<1x64xf32>
    %307 = vector.broadcast %306 : vector<1x64xf32> to vector<8x64xf32>
    %308 = arith.addf %304, %307 : vector<8x64xf32>
    %cst_142 = arith.constant 0.000000e+00 : f32
    %309 = vector.broadcast %cst_142 : f32 to vector<8x64xf32>
    %310 = arith.maximumf %308, %309 : vector<8x64xf32>
    %c1_143 = arith.constant 1 : index
    %c0_144 = arith.constant 0 : index
    %c0_145 = arith.constant 0 : index
    %311 = vector.load %arg15[%c1_143, %c0_144, %c0_145] : memref<2x64x32xf32, #tpu.memory_space<vmem>>, vector<1x64x32xf32>
    %312 = vector.shape_cast %311 : vector<1x64x32xf32> to vector<64x32xf32>
    %cst_146 = arith.constant dense<0.000000e+00> : vector<8x32xf32>
    %313 = tpu.matmul %310, %312, %cst_146 {dimension_numbers = #tpu.dot_dimension_numbers<[1], [0], [0], [1], [0, 0, 1, 1], [], []>} : vector<8x64xf32>, vector<64x32xf32>, vector<8x32xf32> -> vector<8x32xf32>
    %314 = arith.addf %276, %313 : vector<8x32xf32>
    %c1_147 = arith.constant 1 : index
    %c0_148 = arith.constant 0 : index
    %c0_149 = arith.constant 0 : index
    %315 = vector.load %arg16[%c1_147, %c0_148, %c0_149] : memref<2x1x32xf32, #tpu.memory_space<vmem>>, vector<1x1x32xf32>
    %316 = vector.shape_cast %315 : vector<1x1x32xf32> to vector<1x32xf32>
    %317 = vector.broadcast %316 : vector<1x32xf32> to vector<8x32xf32>
    %318 = arith.addf %314, %317 : vector<8x32xf32>
    %c0_150 = arith.constant 0 : index
    %c0_151 = arith.constant 0 : index
    %319 = vector.load %arg17[%c0_150, %c0_151] : memref<1x32xf32, #tpu.memory_space<vmem>>, vector<1x32xf32>
    %c0_152 = arith.constant 0 : index
    %c0_153 = arith.constant 0 : index
    %320 = vector.load %arg18[%c0_152, %c0_153] : memref<1x32xf32, #tpu.memory_space<vmem>>, vector<1x32xf32>
    %cst_154 = arith.constant dense<0.000000e+00> : vector<8xf32>
    %321 = vector.multi_reduction <add>, %318, %cst_154 [1] : vector<8x32xf32> to vector<8xf32>
    %322 = vector.shape_cast %321 : vector<8xf32> to vector<8x1xf32>
    %cst_155 = arith.constant 3.200000e+01 : f32
    %323 = vector.broadcast %cst_155 : f32 to vector<8x1xf32>
    %324 = arith.divf %322, %323 : vector<8x1xf32>
    %325 = vector.broadcast %324 : vector<8x1xf32> to vector<8x32xf32>
    %326 = arith.subf %318, %325 : vector<8x32xf32>
    %327 = arith.mulf %326, %326 : vector<8x32xf32>
    %cst_156 = arith.constant dense<0.000000e+00> : vector<8xf32>
    %328 = vector.multi_reduction <add>, %327, %cst_156 [1] : vector<8x32xf32> to vector<8xf32>
    %329 = vector.shape_cast %328 : vector<8xf32> to vector<8x1xf32>
    %cst_157 = arith.constant 0.0322580636 : f32
    %330 = vector.broadcast %cst_157 : f32 to vector<8x1xf32>
    %331 = arith.mulf %329, %330 : vector<8x1xf32>
    %332 = math.sqrt %331 : vector<8x1xf32>
    %cst_158 = arith.constant 9.99999997E-7 : f32
    %333 = vector.broadcast %cst_158 : f32 to vector<8x1xf32>
    %334 = arith.addf %332, %333 : vector<8x1xf32>
    %335 = tpu.reciprocal %334 : vector<8x1xf32> -> vector<8x1xf32>
    %336 = vector.broadcast %319 : vector<1x32xf32> to vector<8x32xf32>
    %337 = arith.mulf %336, %326 : vector<8x32xf32>
    %338 = vector.broadcast %335 : vector<8x1xf32> to vector<8x32xf32>
    %339 = arith.mulf %337, %338 : vector<8x32xf32>
    %340 = vector.broadcast %320 : vector<1x32xf32> to vector<8x32xf32>
    %341 = arith.addf %339, %340 : vector<8x32xf32>
    %c0_159 = arith.constant 0 : index
    %c0_160 = arith.constant 0 : index
    %c0_161 = arith.constant 0 : index
    %342 = vector.load %arg19[%c0_159, %c0_160, %c0_161] : memref<1x8x32xf32, #tpu.memory_space<vmem>>, vector<1x8x32xf32>
    %343 = vector.shape_cast %342 : vector<1x8x32xf32> to vector<8x32xf32>
    %344 = vector.shape_cast %341 : vector<8x32xf32> to vector<1x8x32xf32>
    tpu.vector_store %arg19[%c0_159, %c0_160, %c0_161], %344 {strides = array<i32>} : memref<1x8x32xf32, #tpu.memory_space<vmem>>, vector<1x8x32xf32>,
    return
  }
  func.func @transform_0(%arg0: i32) -> (i32, i32, i32) {
    %c0_i32 = arith.constant 0 : i32
    %c0_i32_0 = arith.constant 0 : i32
    %c0_i32_1 = arith.constant 0 : i32
    return %arg0, %c0_i32, %c0_i32_0 : i32, i32, i32
  }
  func.func @transform_1(%arg0: i32) -> (i32, i32) {
    %c0_i32 = arith.constant 0 : i32
    %c0_i32_0 = arith.constant 0 : i32
    %c0_i32_1 = arith.constant 0 : i32
    return %c0_i32, %c0_i32_0 : i32, i32
  }
  func.func @transform_2(%arg0: i32) -> (i32, i32) {
    %c0_i32 = arith.constant 0 : i32
    %c0_i32_0 = arith.constant 0 : i32
    %c0_i32_1 = arith.constant 0 : i32
    return %c0_i32, %c0_i32_0 : i32, i32
  }
  func.func @transform_3(%arg0: i32) -> (i32, i32) {
    %c0_i32 = arith.constant 0 : i32
    %c0_i32_0 = arith.constant 0 : i32
    %c0_i32_1 = arith.constant 0 : i32
    return %c0_i32, %c0_i32_0 : i32, i32
  }
  func.func @transform_4(%arg0: i32) -> (i32, i32, i32) {
    %c0_i32 = arith.constant 0 : i32
    %c0_i32_0 = arith.constant 0 : i32
    %c0_i32_1 = arith.constant 0 : i32
    %c0_i32_2 = arith.constant 0 : i32
    return %c0_i32, %c0_i32_0, %c0_i32_1 : i32, i32, i32
  }
  func.func @transform_5(%arg0: i32) -> (i32, i32, i32) {
    %c0_i32 = arith.constant 0 : i32
    %c0_i32_0 = arith.constant 0 : i32
    %c0_i32_1 = arith.constant 0 : i32
    %c0_i32_2 = arith.constant 0 : i32
    return %c0_i32, %c0_i32_0, %c0_i32_1 : i32, i32, i32
  }
  func.func @transform_6(%arg0: i32) -> (i32, i32, i32) {
    %c0_i32 = arith.constant 0 : i32
    %c0_i32_0 = arith.constant 0 : i32
    %c0_i32_1 = arith.constant 0 : i32
    %c0_i32_2 = arith.constant 0 : i32
    return %c0_i32, %c0_i32_0, %c0_i32_1 : i32, i32, i32
  }
  func.func @transform_7(%arg0: i32) -> (i32, i32, i32) {
    %c0_i32 = arith.constant 0 : i32
    %c0_i32_0 = arith.constant 0 : i32
    %c0_i32_1 = arith.constant 0 : i32
    %c0_i32_2 = arith.constant 0 : i32
    return %c0_i32, %c0_i32_0, %c0_i32_1 : i32, i32, i32
  }
  func.func @transform_8(%arg0: i32) -> (i32, i32, i32) {
    %c0_i32 = arith.constant 0 : i32
    %c0_i32_0 = arith.constant 0 : i32
    %c0_i32_1 = arith.constant 0 : i32
    %c0_i32_2 = arith.constant 0 : i32
    return %c0_i32, %c0_i32_0, %c0_i32_1 : i32, i32, i32
  }
  func.func @transform_9(%arg0: i32) -> (i32, i32, i32) {
    %c0_i32 = arith.constant 0 : i32
    %c0_i32_0 = arith.constant 0 : i32
    %c0_i32_1 = arith.constant 0 : i32
    %c0_i32_2 = arith.constant 0 : i32
    return %c0_i32, %c0_i32_0, %c0_i32_1 : i32, i32, i32
  }
  func.func @transform_10(%arg0: i32) -> (i32, i32, i32) {
    %c0_i32 = arith.constant 0 : i32
    %c0_i32_0 = arith.constant 0 : i32
    %c0_i32_1 = arith.constant 0 : i32
    %c0_i32_2 = arith.constant 0 : i32
    return %c0_i32, %c0_i32_0, %c0_i32_1 : i32, i32, i32
  }
  func.func @transform_11(%arg0: i32) -> (i32, i32, i32) {
    %c0_i32 = arith.constant 0 : i32
    %c0_i32_0 = arith.constant 0 : i32
    %c0_i32_1 = arith.constant 0 : i32
    %c0_i32_2 = arith.constant 0 : i32
    return %c0_i32, %c0_i32_0, %c0_i32_1 : i32, i32, i32
  }
  func.func @transform_12(%arg0: i32) -> (i32, i32, i32) {
    %c0_i32 = arith.constant 0 : i32
    %c0_i32_0 = arith.constant 0 : i32
    %c0_i32_1 = arith.constant 0 : i32
    %c0_i32_2 = arith.constant 0 : i32
    return %c0_i32, %c0_i32_0, %c0_i32_1 : i32, i32, i32
  }
  func.func @transform_13(%arg0: i32) -> (i32, i32, i32) {
    %c0_i32 = arith.constant 0 : i32
    %c0_i32_0 = arith.constant 0 : i32
    %c0_i32_1 = arith.constant 0 : i32
    %c0_i32_2 = arith.constant 0 : i32
    return %c0_i32, %c0_i32_0, %c0_i32_1 : i32, i32, i32
  }
  func.func @transform_14(%arg0: i32) -> (i32, i32, i32) {
    %c0_i32 = arith.constant 0 : i32
    %c0_i32_0 = arith.constant 0 : i32
    %c0_i32_1 = arith.constant 0 : i32
    %c0_i32_2 = arith.constant 0 : i32
    return %c0_i32, %c0_i32_0, %c0_i32_1 : i32, i32, i32
  }
  func.func @transform_15(%arg0: i32) -> (i32, i32, i32) {
    %c0_i32 = arith.constant 0 : i32
    %c0_i32_0 = arith.constant 0 : i32
    %c0_i32_1 = arith.constant 0 : i32
    %c0_i32_2 = arith.constant 0 : i32
    return %c0_i32, %c0_i32_0, %c0_i32_1 : i32, i32, i32
  }
  func.func @transform_16(%arg0: i32) -> (i32, i32) {
    %c0_i32 = arith.constant 0 : i32
    %c0_i32_0 = arith.constant 0 : i32
    %c0_i32_1 = arith.constant 0 : i32
    return %c0_i32, %c0_i32_0 : i32, i32
  }
  func.func @transform_17(%arg0: i32) -> (i32, i32) {
    %c0_i32 = arith.constant 0 : i32
    %c0_i32_0 = arith.constant 0 : i32
    %c0_i32_1 = arith.constant 0 : i32
    return %c0_i32, %c0_i32_0 : i32, i32
  }
  func.func @transform_18(%arg0: i32) -> (i32, i32, i32) {
    %c0_i32 = arith.constant 0 : i32
    %c0_i32_0 = arith.constant 0 : i32
    %c0_i32_1 = arith.constant 0 : i32
    return %arg0, %c0_i32, %c0_i32_0 : i32, i32, i32
  }
}

</mosaic_0001>

<bundles_post_ra>
// kernel: tpu_custom_call.1
= control target key start
LH: loop header
LB: loop body
LE: loop exit
PB: predicated region body
PF: predicated region fallthrough
CT: control target
= control target key end

     0   :  { %s4521_s0 = inlined_call_operand.hbm [shape: f32[2,8,8], index: 0, kind: input, shape index: {}]   ;;  %s4522_s1 = inlined_call_operand.hbm [shape: f32[8,32], index: 1, kind: input, shape index: {}]   ;;  %s4523_s2 = inlined_call_operand.hbm [shape: f32[8,32], index: 2, kind: input, shape index: {}]   ;;  %s4524_s3 = inlined_call_operand.vmem [shape: f32[1,32], index: 3, kind: input, shape index: {}]   ;;  %s4525_s4 = inlined_call_operand.vmem [shape: f32[2,1,32], index: 4, kind: input, shape index: {}]   ;;  %s4526_s5 = inlined_call_operand.vmem [shape: f32[2,1,32], index: 5, kind: input, shape index: {}]   ;;  %s4527_s6 = inlined_call_operand.vmem [shape: f32[2,32,96], index: 6, kind: input, shape index: {}]   ;;  %s4528_s7 = inlined_call_operand.vmem [shape: f32[2,1,96], index: 7, kind: input, shape index: {}]   ;;  %s4529_s8 = inlined_call_operand.vmem [shape: f32[2,32,32], index: 8, kind: input, shape index: {}]   ;;  %s4530_s9 = inlined_call_operand.vmem [shape: f32[2,1,32], index: 9, kind: input, shape index: {}]   ;;  %s4531_s10 = inlined_call_operand.vmem [shape: f32[2,1,32], index: 10, kind: input, shape index: {}]   ;;  %s4532_s11 = inlined_call_operand.vmem [shape: f32[2,1,32], index: 11, kind: input, shape index: {}]   ;;  %s4533_s12 = inlined_call_operand.vmem [shape: f32[2,32,64], index: 12, kind: input, shape index: {}]   ;;  %s4534_s13 = inlined_call_operand.vmem [shape: f32[2,1,64], index: 13, kind: input, shape index: {}]   ;;  %s4535_s14 = inlined_call_operand.vmem [shape: f32[2,64,32], index: 14, kind: input, shape index: {}]   ;;  %s4536_s15 = inlined_call_operand.vmem [shape: f32[2,1,32], index: 15, kind: input, shape index: {}]   ;;  %s4537_s16 = inlined_call_operand.vmem [shape: f32[1,32], index: 16, kind: input, shape index: {}]   ;;  %s4538_s17 = inlined_call_operand.vmem [shape: f32[1,32], index: 17, kind: input, shape index: {}]   ;;  %s4539_s18 = inlined_call_operand.hbm [shape: f32[2,8,32], index: 18, kind: output, shape index: {}]  }
   0x1   :  { %4571 = sst [smem:[#allocation14_spill]] %s4521_s0 }
   0x2   :  { %4572 = sst [smem:[#allocation15_spill]] %s4522_s1 }
   0x3   :  { %4573 = sst [smem:[#allocation16_spill]] %s4523_s2 }
   0x4   :  { %4574 = sst [smem:[#allocation17_spill]] %s4524_s3 }
   0x5   :  { %4575 = sst [smem:[#allocation18_spill]] %s4525_s4 }
   0x6   :  { %4576 = sst [smem:[#allocation19_spill]] %s4526_s5 }
   0x7   :  { %4577 = sst [smem:[#allocation20_spill]] %s4527_s6 }
   0x8   :  { %4578 = sst [smem:[#allocation21_spill]] %s4531_s10 }
   0x9   :  { %4579 = sst [smem:[#allocation22_spill]] %s4532_s11 }
   0xa   :  { %4580 = sst [smem:[#allocation23_spill]] %s4534_s13 }
   0xb   :  { %4581 = sst [smem:[#allocation24_spill]] %s4536_s15 }
   0xc   :  { %4582 = sst [smem:[#allocation25_spill]] %s4537_s16 }
   0xd   :  { %4583 = sst [smem:[#allocation26_spill]] %s4538_s17 }
   0xe   :  { %4584 = sst [smem:[#allocation27_spill]] %s4539_s18 }
   0xf   :  { %23 = vsyncpa [#allocation3], 0 }
  0x10   :  { %25 = vsyncpa [#allocation3 + $0x1], 0 }
  0x11   :  { %26 = vsyncpa [#allocation6], 0 }
  0x12   :  { %27 = vsyncpa [#allocation4], 0 }
  0x13   :  { %29 = vsyncpa [#allocation4 + $0x1], 0  ;;  %s3886_s27 = smov 0   ;;  %s3888_s28 = smov 0  }
  0x14   :  { %s3890_s29 = smov 0   ;;  %s3892_s30 = smov 0  }
  0x15 LB: > { %4585 = sst [smem:[#allocation12_spill]] %s3756_s27  ;;  %s3907_s0 = sadd.s32 4294967295, %s3768_s30   ;;  %s3768_s30 = sphi %s3892_s30, %s4637_s30   ;;  %s3764_s29 = sphi %s3890_s29, %s4636_s29   ;;  %s3760_s28 = sphi %s3888_s28, %s4635_s28   ;;  %s3756_s27 = sphi %s3886_s27, %s4634_s27  }
  0x16   : > { %s3049_s19 = sadd.s32 4294967294, %s3768_s30   ;;  %p55_p0 = scmp.ne.s32.totalorder %s3760_s28, %s3756_s27 }
  0x17   : > { %p4548_p1 = scmp.eq.s32.totalorder %s3907_s0, 0  ;;  %p442_p3 = scmp.eq.s32.totalorder %s3049_s19, 1 }
  0x18   : > { %p3050_p5 = scmp.ge.s32.totalorder %s3768_s30, 1  ;;  %p449_p7 = scmp.lt.s32.totalorder %s3768_s30, 3 }
  0x19   : > { %p3916_p4 = por %p4548_p1, %p55_p0  ;;  %p3921_p6 = por %p442_p3, %p55_p0 }
  0x1a   : > { %p3926_p8 = pnand %p3050_p5, %p449_p7  ;;  %s3770_s22 = smov [#allocation5]  }
  0x1b   : > { %s4586_s1 = scalar_select %p3916_p4, 1, 0 }
  0x1c   : > { %s4587_s20 = scalar_select %p3921_p6, 1, 0 }
  0x1d   : > { %s4589_s21 = scalar_select %p3926_p8, 1, 0 }
  0x1e   : > { %4588 = sst [smem:[#allocation13_spill]] %s4587_s20  ;;  %s462_s2 = sshll.u32 %s3770_s22, 4  ;;  %s463_s2 = int_to_ptr.vmem [resolvable:$true] %s462_s2 }
  0x1f   : > { %p3488_p10 = pneg %p3926_p8  ;;  %s3771_s23 = smov [#allocation7]  }
  0x20   : > { %s473_s24 = sshll.u32 %s3771_s23, 4  ;;  %s3942_s26 = sadd.s32 1, %s3768_s30   ;;  %s3939_s24 = int_to_ptr.vmem [resolvable:$true] %s473_s24 }
  0x21   : > { %p3935_p11 = pnand %p3488_p10, %p4548_p1  ;;  %s4591_s27 = sld [smem:[#allocation15_spill]] }
  0x23   : > { %p3614_p13 = pneg %p3935_p11 }
  0x27   : > { %s4592_s18 = smov %s4591_s27  ;;  %s3612_s17 = scalar_lea.hbm %s4591_s27, 128 }
  0x28   : > { %p3613_p12 = scmp.ne.s32.totalorder %s4592_s18, %s3612_s17  ;;  %p3619_p5 = scmp.lt.u32.totalorder %s3612_s17, %s4592_s18 }
  0x2a   : > { %p3615_p0 = pnand %p3614_p13, %p3613_p12 }
  0x2c   : > { %p3616_p3 = pneg %p3615_p0 }
  0x2e   : > { %p3621_p7 = pnand %p3619_p5, %p3616_p3 }
  0x30   : > { %3624 = shalt.err (!%p3621_p7)
}
  0x31   : > { %s3625_s19 = scalar_lea.vmem %s463_s2, 128  ;;  %p3633_p2 = scmp.lt.s32.totalorder %s463_s2, %s463_s2 }
  0x32   : > { %p3626_p10 = scmp.ne.s32.totalorder %s463_s2, %s3625_s19  ;;  %p3634_p6 = scmp.lt.s32.totalorder %s3625_s19, %s3625_s19 }
  0x34   : > { %p3628_p9 = pnand %p3626_p10, %p3614_p13  ;;  %p3635_p4 = por %p3634_p6, %p3633_p2 }
  0x36   : > { %p3629_p1 = pneg %p3628_p9 }
  0x38   : > { %p3636_p8 = pnand %p3635_p4, %p3629_p1 }
  0x3a   : > { %3639 = shalt.err (!%p3636_p8)
}
  0x3b   : > { %3491 = dma.hbm_to_vmem [thread:$0]  (!%p3935_p11), %s4592_s18, 128, %s463_s2, [#allocation6]  }
  0x3c   : > { %s4593_s27 = sld [smem:[#allocation16_spill]] }
  0x42   : > { %s4594_s20 = smov %s4593_s27  ;;  %s3640_s22 = scalar_lea.hbm %s4593_s27, 128 }
  0x43   : > { %p3641_p9 = scmp.ne.s32.totalorder %s4594_s20, %s3640_s22  ;;  %p3647_p4 = scmp.lt.u32.totalorder %s3640_s22, %s4594_s20 }
  0x45   : > { %p3643_p2 = pnand %p3641_p9, %p3614_p13 }
  0x47   : > { %p3644_p1 = pneg %p3643_p2 }
  0x49   : > { %p3649_p6 = pnand %p3647_p4, %p3644_p1 }
  0x4b   : > { %3652 = shalt.err (!%p3649_p6)
}
  0x4c   : > { %s3653_s2 = scalar_lea.vmem %s3939_s24, 128  ;;  %p3661_p3 = scmp.lt.s32.totalorder %s3939_s24, %s3939_s24 }
  0x4d   : > { %p3654_p8 = scmp.ne.s32.totalorder %s3939_s24, %s3653_s2  ;;  %p3662_p5 = scmp.lt.s32.totalorder %s3653_s2, %s3653_s2 }
  0x4f   : > { %p3656_p12 = pnand %p3654_p8, %p3614_p13  ;;  %p3663_p7 = por %p3662_p5, %p3661_p3 }
  0x51   : > { %p3657_p0 = pneg %p3656_p12 }
  0x53   : > { %p3664_p10 = pnand %p3663_p7, %p3657_p0 }
  0x55   : > { %3667 = shalt.err (!%p3664_p10)
}
  0x56   : > { %3494 = dma.hbm_to_vmem [thread:$0]  (!%p3935_p11), %s4594_s20, 128, %s3939_s24, [#allocation6]  }
  0x57   : > { %s4595_s15 = ssub.s32 %s3768_s30, %s3942_s26  ;;  %s42_s16 = sadd.s32 1, %s3764_s29 }
  0x58   : > { %p40_p13 = scmp.eq.s32.totalorder %s4595_s15, 0  ;;  %p49_p9 = scmp.ne.s32.totalorder %s3764_s29, %s3760_s28 }
  0x59   : > { %p50_p2 = scmp.eq.s32.totalorder %s3768_s30, 0  ;;  %p4596_p4 = scmp.eq.s32.totalorder %s3907_s0, 1 }
  0x5a   : > { %s4001_s25 = scalar_select %p40_p13, %s3764_s29, %s42_s16  }
  0x5b   : > { %p51_p1 = por %p50_p2, %p49_p9  ;;  %p4005_p6 = por %p4596_p4, %p49_p9 }
  0x5c   : > { %p3505_p8 = scmp.lt.s32.totalorder %s3768_s30, 2  ;;  %s529_s17 = sand.u32 1, %s3764_s29  }
  0x5d   : > { %s3054_s27 = sshll.u32 %s529_s17, 3  ;;  %s3055_s22 = sshll.u32 %s3768_s30, 7 }
  0x5e   : > { %s4598_s24 = sld [smem:[#allocation14_spill]]  ;;  %s533_s10 = scalar_lea.vmem [#allocation2], %s3054_s27 }
  0x5f   : > { %s540_s11 = sshll.u32 %s533_s10, 4  ;;  %p4019_p11 = pnand %p3505_p8, %p51_p1  ;;  %s4017_s11 = int_to_ptr.vmem [resolvable:$true] %s540_s11 }
  0x60   : > { %s530_s16 = scalar_lea.sflag [#allocation3], %s529_s17 }
  0x61   : > { %p3670_p0 = pneg %p4019_p11 }
  0x64   : > { %s4015_s2 = scalar_lea.hbm %s4598_s24, %s3055_s22  ;;  %s3673_s23 = scalar_lea.hbm %s4598_s24, 256 }
  0x65   : > { %s3668_s18 = scalar_lea.hbm %s4015_s2, 128  ;;  %p3674_p7 = scmp.lt.u32.totalorder %s4015_s2, %s4598_s24 }
  0x66   : > { %p3669_p12 = scmp.ne.s32.totalorder %s4015_s2, %s3668_s18  ;;  %p3675_p10 = scmp.lt.u32.totalorder %s3673_s23, %s3668_s18 }
  0x67   : > { %p3677_p9 = scmp.lt.u32.totalorder %s3668_s18, %s4015_s2 }
  0x68   : > { %p3671_p3 = pnand %p3670_p0, %p3669_p12  ;;  %p3676_p13 = por %p3675_p10, %p3674_p7 }
  0x6a   : > { %p3672_p5 = pneg %p3671_p3  ;;  %p3678_p2 = por %p3677_p9, %p3676_p13 }
  0x6c   : > { %p3679_p1 = pnand %p3678_p2, %p3672_p5 }
  0x6e   : > { %3682 = shalt.err (!%p3679_p1)
}
  0x6f   : > { %s3683_s17 = scalar_lea.vmem %s4017_s11, 128  ;;  %s3772_s22 = smov [#allocation2]  }
  0x70   : > { %p3684_p4 = scmp.ne.s32.totalorder %s4017_s11, %s3683_s17  ;;  %s3688_s27 = sshll.u32 %s3772_s22, 4  ;;  %s3689_s27 = int_to_ptr.vmem [resolvable:$false] %s3688_s27 }
  0x71   : > { %s3690_s19 = scalar_lea.vmem %s3689_s27, 256  ;;  %p3691_p3 = scmp.lt.s32.totalorder %s4017_s11, %s3689_s27 }
  0x72   : > { %p3686_p8 = pnand %p3684_p4, %p3670_p0  ;;  %p3692_p7 = scmp.lt.s32.totalorder %s3690_s19, %s3683_s17 }
  0x74   : > { %p3687_p12 = pneg %p3686_p8  ;;  %p3693_p10 = por %p3692_p7, %p3691_p3 }
  0x76   : > { %p3694_p13 = pnand %p3693_p10, %p3687_p12 }
  0x78   : > { %3697 = shalt.err (!%p3694_p13)
}
  0x79   : > { %3498 = dma.hbm_to_vmem [thread:$0]  (!%p4019_p11), %s4015_s2, 128, %s4017_s11, %s530_s16  }
  0x7a   : > { %p4600_p5 = scmp.ne.s32.totalorder %s4589_s21, 0 }
  0x7b   : > { %s4051_s18 = sand.u32 (!%p4600_p5), 1, %s3760_s28   ;;  %p4601_p0 = scmp.ne.s32.totalorder (!%p4600_p5), %s4586_s1, 0 }
  0x7c   : > { %549 = sbr.rel (%p4600_p5) target bundleno = 5702 (0x1646), region = 92  ;;  %s4554_s23 = sshll.u32 (!%p4600_p5), %s4051_s18, 3 }
  0x7d   : > { %s552_s10 = scalar_lea.sflag (!%p4600_p5), [#allocation3], %s4051_s18  ;;  %s555_s17 = scalar_lea.vmem (!%p4600_p5), [#allocation2], %s4554_s23 }
  0x83   : > { %3743 = dma.done.wait (%p4601_p0), %s552_s10, 128  }
  0x84   : > { %3745 = vsyncadd (%p4601_p0), %s552_s10, 4294967168  ;;  %p4602_p11 = scmp.eq.s32.totalorder %s3907_s0, 0 }
  0x86   : > { %3747 = dma.done.wait (%p4602_p11), [#allocation6], 256   ;;  %p4603_p9 = pmov %p4602_p11 }
  0x87   : > { %v3773_v0 = vmov 0.0   ;;  %vm3774_vm0 = vmmov 0   ;;  %vm625_vm1 = vcmask 64512   ;;  %v617_v1 = vld [vmem:[#allocation7] sm:$0xff]  ;;  %v616_v2 = vld [vmem:[%s555_s17] sm:$0xff]  ;;  %s4604_s3 = sld [smem:[#allocation17_spill]] }
  0x88   : > { %3749 = vsyncadd (%p4603_p9), [#allocation6], 4294967040  ;;  %3227 = vmatprep.subr.mxu0 %v3773_v0  ;;  %3229 = vmatprep.mubr.msk.f32.mxu0 %vm3774_vm0, %v3773_v0  ;;  %v700_v7 = vld [vmem:[#allocation5] sm:$0xff]  ;;  %vm704_vm2 = vcmask 261120   ;;  %s4605_s6 = sld [smem:[#allocation20_spill]]  ;;  %v3775_v19 = vmov 0.0|0.0  }
  0x89   : > { %3253 = vmatprep.subr.mxu1 %v3773_v0  ;;  %3255 = vmatprep.mubr.msk.f32.mxu1 %vm3774_vm0, %v3773_v0  ;;  %s4606_s4 = sld [smem:[#allocation18_spill]]  ;;  %s4607_s5 = sld [smem:[#allocation19_spill]]  ;;  %v3065_v37 = vld [vmem:[%s4528_s7] ss:$0 sm:$0xff]  ;;  %vm1500_vm5 = vcmask 130048   ;;  %vm1502_vm6 = vcmask 195584  }
  0x8a   : > { %3228 = vmatpush3.msra.mxu0 %v617_v1  ;;  %s4566_s16 = smov 120   ;;  %s4567_s22 = smov 96   ;;  %vm1719_vm9 = vcmask 523264  }
  0x8b   : > { %3230 = vmatmul.mubr.msk.f32.vlgmr.msra.gmra.mrb[0].mxu0 %vm625_vm1, %v616_v2  ;;  %3416 = vmatprep.subr.bf16.mxu0 %v3775_v19  ;;  %s4568_s27 = smov 88   ;;  %s4565_s19 = smov 80  }
  0x8c   : > { %3240 = vmatprep.mubr.msk.f32.mxu0 %vm3774_vm0, %v3773_v0  ;;  %s4561_s10 = smov 112   ;;  %s4560_s17 = smov 72  }
  0x8d   : > { %v3061_v3 = vld [vmem:[%s4604_s3] ss:$0 sm:$0xff]  ;;  %s4559_s1 = smov 104   ;;  %s4558_s21 = smov 64  }
  0x8e   : > { %v740_v16 = vld [vmem:[%s4605_s6] sm:$0xff]  ;;  %v741_v17 = vld [vmem:[%s4605_s6 + $0x8] sm:$0xff]  ;;  %v742_v18 = vld [vmem:[%s4605_s6 + $0x10] sm:$0xff]  ;;  %s4557_s2 = smov 48   ;;  %s4556_s11 = smov 40  }
  0x8f   : > { %v3417_v20 = vpack.c.bf16 %v741_v17, %v740_v16  ;;  %v743_v21 = vld [vmem:[%s4605_s6 + $0x18] sm:$0xff]  ;;  %v3063_v31 = vld [vmem:[%s4606_s4] ss:$0 sm:$0xff]  ;;  %s4555_s15 = smov 56   ;;  %s4564_s23 = smov 8  }
  0x90   : > { %v3420_v22 = vpack.c.bf16 %v743_v21, %v742_v18  ;;  %v3064_v34 = vld [vmem:[%s4607_s5] ss:$0 sm:$0xff]  ;;  %s3142_s3 = sshll.u32 %s3907_s0, 7  ;;  %s3790_s0 = smov [#allocation8]  }
  0x91   : > { %3418 = vmatpush3.bf16.msra.mxu0 %v3417_v20 }
  0x92   : > { %3419 = vmatprep.subr.bf16.mxu0 %v3775_v19 }
  0x95   : > { %3421 = vmatpush3.bf16.msra.mxu0 %v3420_v22 }
  0x96   : > { %3243 = vmatprep.subr.mxu0 %v3773_v0 }
 0x15e   : > { %v695_v4 = vpop.f32.mrb[0].mxu0 }
 0x15f   : > { %v696_v5 = vadd.f32 %v3061_v3, %v695_v4  ;;  %v3231_v6 = vpop.f32.mrb[1].mxu0 }
 0x161   : > { %v699_v8 = vmul.f32 5.656854, %v696_v5 }
 0x163   : > { %v4077_v9 = vadd.f32 %v700_v7, %v699_v8 }
 0x165   : > { %v705_v10 = vsel %vm704_vm2, %v4077_v9, 0.0 }
 0x166   : > { %706 = vadd.xlane.f32.xlu0 %v705_v10 }
 0x1f3   : > { %v707_v11 = vpop.xlane.xlu0 %706 }
 0x1f4   : > { %v709_v12 = vmul.f32 0.03125, %v707_v11 }
 0x1f6   : > { %v710_v13 = vsub.f32 %v4077_v9, %v709_v12 }
 0x1f8   : > { %v711_v14 = vmul.f32 %v710_v13, %v710_v13  ;;  %v731_v32 = vmul.f32 %v3063_v31, %v710_v13 }
 0x1fa   : > { %v712_v15 = vsel %vm704_vm2, %v711_v14, 0.0 }
 0x1fb   : > { %713 = vadd.xlane.f32.xlu0 %v712_v15 }
 0x288   : > { %v714_v23 = vpop.xlane.xlu0 %713 }
 0x289   : > { %v715_v24 = vmul.f32 0.032258064, %v714_v23 }
 0x28b   : > { %3560 = vrsqrt.f32 %v715_v24  ;;  %vm718_vm3 = vcmp.eq.f32.partialorder %v715_v24, inf  ;;  %v721_v27 = vand.u32 2147483648, %v715_v24  ;;  %vm720_vm4 = vcmp.eq.f32.partialorder %v715_v24, 0.0 }
 0x295   : > { %v3561_v25 = vpop.eup %3560 }
 0x296   : > { %v717_v26 = vmul.f32 %v3561_v25, %v715_v24 }
 0x298   : > { %v719_v28 = vsel %vm718_vm3, %v715_v24, %v717_v26 }
 0x299   : > { %v722_v29 = vsel %vm720_vm4, %v721_v27, %v719_v28 }
 0x29a   : > { %v723_v30 = vadd.f32 1e-06, %v722_v29 }
 0x29c   : > { %3562 = vrcp.f32 %v723_v30 }
 0x2a6   : > { %v3563_v33 = vpop.eup %3562 }
 0x2a7   : > { %v732_v35 = vmul.f32 %v3563_v33, %v731_v32 }
 0x2a9   : > { %v739_v36 = vadd.f32 %v3064_v34, %v732_v35 }
 0x2ab   : > { %3241 = vmatmul.mubr.msk.f32.vlgmr.msra.gmra.mrb[2].mxu0 %vm704_vm2, %v739_v36 }
 0x2ac   : > { %3245 = vmatprep.mubr.msk.f32.mxu0 %vm3774_vm0, %v3773_v0 }
 0x37e   : > { %v820_v38 = vpop.f32.mrb[2].mxu0 }
 0x37f   : > { %v4110_v39 = vadd.f32 %v3065_v37, %v820_v38  ;;  %v3242_v40 = vpop.f32.mrb[3].mxu0 }
 0x380   : > { %v1505_v40 = vld [vmem:[%s4529_s8 + $0x8] sm:$0xff] }
 0x381   : > { %989 = vrot.lane.b32.xlu0 %v4110_v39, %s4566_s16  ;;  %825 = vrot.lane.b32.xlu1 %v4110_v39, %s4567_s22  ;;  %s4614_s16 = smov 120   ;;  %s4615_s22 = smov 80  }
 0x385   : > { %991 = vrot.lane.b32.xlu1 %v4110_v39, %s4568_s27  ;;  %s4616_s27 = smov 112  }
 0x389   : > { %1157 = vrot.lane.b32.xlu1 %v4110_v39, %s4565_s19  ;;  %s4617_s19 = smov 72  }
 0x38d   : > { %1155 = vrot.lane.b32.xlu1 %v4110_v39, %s4561_s10  ;;  %s4618_s10 = smov 104  }
 0x391   : > { %1323 = vrot.lane.b32.xlu1 %v4110_v39, %s4560_s17  ;;  %s4619_s17 = smov 64  }
 0x395   : > { %1321 = vrot.lane.b32.xlu1 %v4110_v39, %s4559_s1  ;;  %s4562_s1 = smov 24  }
 0x3f3   : > { %v826_v41 = vpop.permute.xlu1 %825  ;;  %v990_v43 = vpop.permute.xlu0 %989 }
 0x3f4   : > { %3244 = vmatpush3.xpose.msk.msra.mxu0 %vm625_vm1, %v826_v41 }
 0x3f5   : > { %3248 = vmatprep.subr.mxu0 %v3773_v0 }
 0x3f7   : > { %3246 = vmatmul.mubr.msk.f32.vlgmr.msra.gmra.mrb[4].mxu0 %vm625_vm1, %v4110_v39  ;;  %v992_v42 = vpop.permute.xlu1 %991 }
 0x3f8   : > { %3254 = vmatpush3.xpose.msk.msra.mxu1 %vm625_vm1, %v992_v42  ;;  %3250 = vmatprep.mubr.msk.f32.mxu0 %vm3774_vm0, %v3773_v0 }
 0x3f9   : > { %3263 = vmatprep.subr.mxu1 %v3773_v0 }
 0x3fb   : > { %3256 = vmatmul.mubr.msk.f32.vlgmr.msra.gmra.mrb[0].mxu1 %vm625_vm1, %v990_v43  ;;  %v1158_v44 = vpop.permute.xlu1 %1157 }
 0x3fc   : > { %3264 = vmatpush3.xpose.msk.msra.mxu1 %vm625_vm1, %v1158_v44  ;;  %3265 = vmatprep.mubr.msk.f32.mxu1 %vm3774_vm0, %v3773_v0  ;;  %v1506_v44 = vld [vmem:[%s4529_s8 + $0x10] sm:$0xff] }
 0x3fd   : > { %3273 = vmatprep.subr.mxu1 %v3773_v0 }
 0x3ff   : > { %v1156_v45 = vpop.permute.xlu1 %1155 }
 0x400   : > { %3266 = vmatmul.mubr.msk.f32.vlgmr.msra.gmra.mrb[2].mxu1 %vm625_vm1, %v1156_v45  ;;  %v1507_v45 = vld [vmem:[%s4529_s8 + $0x18] sm:$0xff] }
 0x401   : > { %3275 = vmatprep.mubr.msk.f32.mxu1 %vm3774_vm0, %v3773_v0 }
 0x403   : > { %v1324_v46 = vpop.permute.xlu1 %1323 }
 0x404   : > { %3274 = vmatpush3.xpose.msk.msra.mxu1 %vm625_vm1, %v1324_v46  ;;  %v3426_v46 = vpack.c.bf16 %v1507_v45, %v1506_v44 }
 0x405   : > { %3422 = vmatprep.subr.bf16.mxu1 %v3775_v19 }
 0x407   : > { %v1322_v47 = vpop.permute.xlu1 %1321 }
 0x408   : > { %3276 = vmatmul.mubr.msk.f32.vlgmr.msra.gmra.mrb[4].mxu1 %vm625_vm1, %v1322_v47 }
 0x409   : > { %3291 = vmatprep.mubr.msk.f32.mxu1 %vm3774_vm0, %v3773_v0 }
 0x4ca   : > { %v897_v48 = vpop.f32.mrb[4].mxu0 }
 0x4cb   : > { %v901_v49 = vmul.f32 0.35355338, %v897_v48  ;;  %v3247_v50 = vpop.f32.mrb[5].mxu0 }
 0x4cd   : > { %v902_v51 = vsel %vm625_vm1, %v901_v49, -inf }
 0x4ce   : > { %v1063_v52 = vpop.f32.mrb[0].mxu1  ;;  %903 = vmax.xlane.f32.xlu1 %v902_v51 }
 0x4cf   : > { %v1067_v53 = vmul.f32 0.35355338, %v1063_v52  ;;  %v3257_v54 = vpop.f32.mrb[1].mxu1 }
 0x4d1   : > { %v1068_v55 = vsel %vm625_vm1, %v1067_v53, -inf }
 0x4d2   : > { %1069 = vmax.xlane.f32.xlu0 %v1068_v55 }
 0x4d3   : > { %v1229_v56 = vpop.f32.mrb[2].mxu1 }
 0x4d4   : > { %v1233_v57 = vmul.f32 0.35355338, %v1229_v56  ;;  %v3267_v58 = vpop.f32.mrb[3].mxu1 }
 0x4d6   : > { %v1234_v59 = vsel %vm625_vm1, %v1233_v57, -inf }
 0x4d7   : > { %1235 = vmax.xlane.f32.xlu1 %v1234_v59 }
 0x4db   : > { %v1395_v60 = vpop.f32.mrb[4].mxu1 }
 0x4dc   : > { %v1399_v61 = vmul.f32 0.35355338, %v1395_v60  ;;  %v3277_v62 = vpop.f32.mrb[5].mxu1  ;;  %v3080_v60 = vld [vmem:[%s4530_s9] ss:$0 sm:$0xff] }
 0x4de   : > { %v1400_v63 = vsel %vm625_vm1, %v1399_v61, -inf }
 0x4df   : > { %1401 = vmax.xlane.f32.xlu0 %v1400_v63 }
 0x4e8   : > { %913 = vrot.lane.b32.xlu1 %v4110_v39, %s4558_s21  ;;  %s4612_s21 = smov 88  }
 0x55b   : > { %v904_v1 = vpop.xlane.xlu1 %903 }
 0x55c   : > { %v905_v2 = vsub.f32 %v901_v49, %v904_v1 }
 0x55e   : > { %v906_v3 = vmul.f32 1.442695, %v905_v2 }
 0x55f   : > { %v1070_v4 = vpop.xlane.xlu0 %1069 }
 0x560   : > { %3564 = vpow2.f32 %v906_v3  ;;  %v1071_v5 = vsub.f32 %v1067_v53, %v1070_v4 }
 0x562   : > { %v1072_v6 = vmul.f32 1.442695, %v1071_v5 }
 0x564   : > { %3566 = vpow2.f32 %v1072_v6  ;;  %v1236_v7 = vpop.xlane.xlu1 %1235 }
 0x565   : > { %v1237_v8 = vsub.f32 %v1233_v57, %v1236_v7  ;;  %v1626_v7 = vld [vmem:[%s4533_s12] sm:$0xff] }
 0x567   : > { %v1238_v10 = vmul.f32 1.442695, %v1237_v8  ;;  %v1628_v8 = vld [vmem:[%s4533_s12 + $0x10] sm:$0xff] }
 0x568   : > { %v914_v11 = vpop.permute.xlu1 %913 }
 0x569   : > { %3568 = vpow2.f32 %v1238_v10  ;;  %3249 = vmatpush3.msra.mxu0 %v914_v11  ;;  %v1629_v11 = vld [vmem:[%s4533_s12 + $0x18] sm:$0xff] }
 0x56a   : > { %v3565_v12 = vpop.eup %3564  ;;  %3258 = vmatprep.subr.mxu0 %v3773_v0 }
 0x56b   : > { %v908_v13 = vsel %vm625_vm1, %v3565_v12, 0.0 }
 0x56c   : > { %v1402_v14 = vpop.xlane.xlu0 %1401  ;;  %909 = vadd.xlane.f32.xlu1 %v908_v13  ;;  %v1711_v13 = vld [vmem:[%s4535_s14] sm:$0xff] }
 0x56d   : > { %v1403_v15 = vsub.f32 %v1399_v61, %v1402_v14  ;;  %v1712_v14 = vld [vmem:[%s4535_s14 + $0x8] sm:$0xff] }
 0x56e   : > { %v3567_v16 = vpop.eup %3566 }
 0x56f   : > { %v1404_v17 = vmul.f32 1.442695, %v1403_v15  ;;  %v1074_v18 = vsel %vm625_vm1, %v3567_v16, 0.0  ;;  %v1713_v15 = vld [vmem:[%s4535_s14 + $0x10] sm:$0xff] }
 0x570   : > { %1075 = vadd.xlane.f32.xlu0 %v1074_v18 }
 0x571   : > { %3570 = vpow2.f32 %v1404_v17  ;;  %v1714_v17 = vld [vmem:[%s4535_s14 + $0x18] sm:$0xff] }
 0x572   : > { %v3438_v18 = vpack.c.bf16 %v1714_v17, %v1713_v15 }
 0x573   : > { %v3569_v20 = vpop.eup %3568 }
 0x574   : > { %v1240_v21 = vsel %vm625_vm1, %v3569_v20, 0.0 }
 0x575   : > { %1241 = vadd.xlane.f32.xlu1 %v1240_v21  ;;  %v1716_v21 = vld [vmem:[%s4535_s14 + $0x28] sm:$0xff] }
 0x57b   : > { %v3571_v22 = vpop.eup %3570 }
 0x57c   : > { %v1406_v23 = vsel %vm625_vm1, %v3571_v22, 0.0 }
 0x57d   : > { %1407 = vadd.xlane.f32.xlu0 %v1406_v23 }
 0x586   : > { %1245 = vrot.lane.b32.xlu1 %v4110_v39, %s4557_s2  ;;  %s4563_s2 = smov 16  }
 0x58a   : > { %1411 = vrot.lane.b32.xlu1 %v4110_v39, %s4556_s11  ;;  %s4613_s11 = smov 96  }
 0x593   : > { %1079 = vrot.lane.b32.xlu0 %v4110_v39, %s4555_s15  ;;  %v1504_v39 = vld [vmem:[%s4529_s8] sm:$0xff]  ;;  %s4611_s15 = sld [smem:[#allocation24_spill]] }
 0x594   : > { %v3423_v41 = vpack.c.bf16 %v1505_v40, %v1504_v39 }
 0x596   : > { %3424 = vmatpush3.bf16.msra.mxu1 %v3423_v41 }
 0x597   : > { %3425 = vmatprep.subr.bf16.mxu1 %v3775_v19 }
 0x59a   : > { %3427 = vmatpush3.bf16.msra.mxu1 %v3426_v46  ;;  %v3086_v46 = vld [vmem:[%s4611_s15] ss:$0 sm:$0xff] }
 0x59b   : > { %3434 = vmatprep.subr.bf16.mxu1 %v3775_v19 }
 0x5f9   : > { %v910_v24 = vpop.xlane.xlu1 %909 }
 0x5fa   : > { %3572 = vrcp.f32 %v910_v24 }
 0x5fd   : > { %v1076_v25 = vpop.xlane.xlu0 %1075 }
 0x5fe   : > { %3574 = vrcp.f32 %v1076_v25 }
 0x602   : > { %v1242_v26 = vpop.xlane.xlu1 %1241 }
 0x603   : > { %3576 = vrcp.f32 %v1242_v26 }
 0x604   : > { %v3573_v27 = vpop.eup %3572 }
 0x605   : > { %v912_v28 = vmul.f32 %v3573_v27, %v3565_v12  ;;  %v3432_v12 = vpack.c.bf16 %v1629_v11, %v1628_v8 }
 0x606   : > { %v1246_v32 = vpop.permute.xlu1 %1245 }
 0x607   : > { %3251 = vmatmul.mubr.msk.f32.vlgmr.msra.gmra.mrb[6].mxu0 %vm625_vm1, %v912_v28 }
 0x608   : > { %3260 = vmatprep.mubr.msk.f32.mxu0 %vm3774_vm0, %v3773_v0  ;;  %v3575_v30 = vpop.eup %3574 }
 0x609   : > { %v1078_v31 = vmul.f32 %v3575_v30, %v3567_v16  ;;  %v3435_v16 = vpack.c.bf16 %v1712_v14, %v1711_v13  ;;  %v3096_v13 = vld [vmem:[%s4528_s7 + $0x1] ss:$0 sm:$0xff] }
 0x60a   : > { %v1408_v29 = vpop.xlane.xlu0 %1407  ;;  %v1412_v36 = vpop.permute.xlu1 %1411 }
 0x60b   : > { %3578 = vrcp.f32 %v1408_v29 }
 0x60d   : > { %v3577_v34 = vpop.eup %3576 }
 0x60e   : > { %v1080_v33 = vpop.permute.xlu0 %1079  ;;  %v1244_v35 = vmul.f32 %v3577_v34, %v3569_v20  ;;  %v1715_v20 = vld [vmem:[%s4535_s14 + $0x20] sm:$0xff] }
 0x60f   : > { %3259 = vmatpush3.msra.mxu0 %v1080_v33 }
 0x610   : > { %3261 = vmatmul.mubr.msk.f32.vlgmr.msra.gmra.mrb[8].mxu0 %vm625_vm1, %v1078_v31  ;;  %3268 = vmatprep.subr.mxu0 %v3773_v0 }
 0x611   : > { %3269 = vmatpush3.msra.mxu0 %v1246_v32  ;;  %3270 = vmatprep.mubr.msk.f32.mxu0 %vm3774_vm0, %v3773_v0 }
 0x612   : > { %3278 = vmatprep.subr.mxu0 %v3773_v0 }
 0x614   : > { %3271 = vmatmul.mubr.msk.f32.vlgmr.msra.gmra.mrb[10].mxu0 %vm625_vm1, %v1244_v35 }
 0x615   : > { %v3579_v37 = vpop.eup %3578  ;;  %3279 = vmatpush3.msra.mxu0 %v1412_v36  ;;  %3280 = vmatprep.mubr.msk.f32.mxu0 %vm3774_vm0, %v3773_v0 }
 0x616   : > { %v1410_v38 = vmul.f32 %v3579_v37, %v3571_v22  ;;  %3428 = vmatprep.subr.bf16.mxu0 %v3775_v19  ;;  %v3441_v22 = vpack.c.bf16 %v1716_v21, %v1715_v20  ;;  %v1717_v37 = vld [vmem:[%s4535_s14 + $0x30] sm:$0xff] }
 0x618   : > { %3281 = vmatmul.mubr.msk.f32.vlgmr.msra.gmra.mrb[12].mxu0 %vm625_vm1, %v1410_v38  ;;  %v1718_v38 = vld [vmem:[%s4535_s14 + $0x38] sm:$0xff] }
 0x619   : > { %3302 = vmatprep.mubr.msk.f32.mxu0 %vm3774_vm0, %v3773_v0  ;;  %v3444_v39 = vpack.c.bf16 %v1718_v38, %v1717_v37 }
 0x6da   : > { %v985_v42 = vpop.f32.mrb[6].mxu0 }
 0x6db   : > { %v3252_v43 = vpop.f32.mrb[7].mxu0 }
 0x6e3   : > { %v1151_v47 = vpop.f32.mrb[8].mxu0 }
 0x6e4   : > { %1488 = vrot.lane.b32.xlu0 %v1151_v47, %s4564_s23  ;;  %v3262_v48 = vpop.f32.mrb[9].mxu0  ;;  %s4610_s23 = sld [smem:[#allocation23_spill]] }
 0x6e7   : > { %v1317_v49 = vpop.f32.mrb[10].mxu0 }
 0x6e8   : > { %1492 = vrot.lane.b32.xlu1 %v1317_v49, %s4563_s2  ;;  %v3272_v50 = vpop.f32.mrb[11].mxu0  ;;  %s4609_s2 = sld [smem:[#allocation22_spill]] }
 0x6ea   : > { %v3083_v40 = vld [vmem:[%s4610_s23] ss:$0 sm:$0xff] }
 0x6eb   : > { %v1483_v51 = vpop.f32.mrb[12].mxu0 }
 0x6ec   : > { %1496 = vrot.lane.b32.xlu0 %v1483_v51, %s4562_s1  ;;  %v3282_v52 = vpop.f32.mrb[13].mxu0  ;;  %s4608_s1 = sld [smem:[#allocation21_spill]] }
 0x6ee   : > { %v3082_v34 = vld [vmem:[%s4609_s2] ss:$0 sm:$0xff] }
 0x6f2   : > { %v3081_v31 = vld [vmem:[%s4608_s1] ss:$0 sm:$0xff] }
 0x756   : > { %v1489_v53 = vpop.permute.xlu0 %1488 }
 0x757   : > { %v1499_v55 = vsel %vm625_vm1, %v985_v42, %v1489_v53 }
 0x75a   : > { %v1493_v54 = vpop.permute.xlu1 %1492 }
 0x75b   : > { %v1501_v56 = vsel %vm1500_vm5, %v1499_v55, %v1493_v54 }
 0x75e   : > { %v1497_v57 = vpop.permute.xlu0 %1496 }
 0x75f   : > { %v1503_v58 = vsel %vm1502_vm6, %v1501_v56, %v1497_v57  ;;  %v3091_v56 = vld [vmem:[%s4605_s6 + $0x20] sm:$0xff]  ;;  %v3092_v57 = vld [vmem:[%s4605_s6 + $0x28] sm:$0xff] }
 0x760   : > { %3292 = vmatmul.mubr.msk.f32.vlgmr.msra.gmra.mrb[6].mxu1 %vm704_vm2, %v1503_v58  ;;  %v3093_v58 = vld [vmem:[%s4605_s6 + $0x30] sm:$0xff] }
 0x761   : > { %3321 = vmatprep.mubr.msk.f32.mxu1 %vm3774_vm0, %v3773_v0  ;;  %3436 = vmatpush3.bf16.msra.mxu1 %v3435_v16 }
 0x762   : > { %3437 = vmatprep.subr.bf16.mxu1 %v3775_v19 }
 0x765   : > { %3439 = vmatpush3.bf16.msra.mxu1 %v3438_v18 }
 0x766   : > { %3440 = vmatprep.subr.bf16.mxu1 %v3775_v19 }
 0x769   : > { %3442 = vmatpush3.bf16.msra.mxu1 %v3441_v22 }
 0x76a   : > { %3443 = vmatprep.subr.bf16.mxu1 %v3775_v19 }
 0x76d   : > { %3445 = vmatpush3.bf16.msra.mxu1 %v3444_v39 }
 0x76e   : > { %3345 = vmatprep.subr.mxu1 %v3773_v0 }
 0x833   : > { %v1577_v59 = vpop.f32.mrb[6].mxu1 }
 0x834   : > { %v1581_v61 = vadd.f32 %v1577_v59, %v4077_v9  ;;  %v3293_v62 = vpop.f32.mrb[7].mxu1  ;;  %v1627_v9 = vld [vmem:[%s4533_s12 + $0x8] sm:$0xff]  ;;  %v3447_v59 = vpack.c.bf16 %v3092_v57, %v3091_v56 }
 0x835   : > { %v3429_v10 = vpack.c.bf16 %v1627_v9, %v1626_v7  ;;  %v3089_v7 = vld [vmem:[%s4606_s4 + $0x1] ss:$0 sm:$0xff] }
 0x836   : > { %v4206_v63 = vadd.f32 %v3080_v60, %v1581_v61  ;;  %v3094_v60 = vld [vmem:[%s4605_s6 + $0x38] sm:$0xff] }
 0x837   : > { %3430 = vmatpush3.bf16.msra.mxu0 %v3429_v10  ;;  %v3450_v61 = vpack.c.bf16 %v3094_v60, %v3093_v58  ;;  %v3090_v10 = vld [vmem:[%s4607_s5 + $0x1] ss:$0 sm:$0xff]  ;;  %s4629_s5 = sld [smem:[#allocation27_spill]] }
 0x838   : > { %v1592_v1 = vsel %vm704_vm2, %v4206_v63, 0.0  ;;  %3431 = vmatprep.subr.bf16.mxu0 %v3775_v19 }
 0x839   : > { %1593 = vadd.xlane.f32.xlu1 %v1592_v1 }
 0x83b   : > { %3433 = vmatpush3.bf16.msra.mxu0 %v3432_v12 }
 0x83c   : > { %3446 = vmatprep.subr.bf16.mxu0 %v3775_v19 }
 0x83d   : > { %s4476_s6 = scalar_lea.hbm %s4629_s5, %s3142_s3 }
 0x8c6   : > { %v1594_v2 = vpop.xlane.xlu1 %1593 }
 0x8c7   : > { %v1595_v3 = vmul.f32 0.03125, %v1594_v2 }
 0x8c9   : > { %v1596_v4 = vsub.f32 %v4206_v63, %v1595_v3 }
 0x8cb   : > { %v1597_v5 = vmul.f32 %v1596_v4, %v1596_v4  ;;  %v1617_v32 = vmul.f32 %v3081_v31, %v1596_v4 }
 0x8cd   : > { %v1598_v6 = vsel %vm704_vm2, %v1597_v5, 0.0 }
 0x8ce   : > { %1599 = vadd.xlane.f32.xlu0 %v1598_v6 }
 0x95b   : > { %v1600_v23 = vpop.xlane.xlu0 %1599 }
 0x95c   : > { %v1601_v24 = vmul.f32 0.032258064, %v1600_v23 }
 0x95e   : > { %3580 = vrsqrt.f32 %v1601_v24  ;;  %vm1604_vm7 = vcmp.eq.f32.partialorder %v1601_v24, inf  ;;  %v1607_v27 = vand.u32 2147483648, %v1601_v24  ;;  %vm1606_vm8 = vcmp.eq.f32.partialorder %v1601_v24, 0.0 }
 0x968   : > { %v3581_v25 = vpop.eup %3580 }
 0x969   : > { %v1603_v26 = vmul.f32 %v3581_v25, %v1601_v24 }
 0x96b   : > { %v1605_v28 = vsel %vm1604_vm7, %v1601_v24, %v1603_v26 }
 0x96c   : > { %v1608_v29 = vsel %vm1606_vm8, %v1607_v27, %v1605_v28 }
 0x96d   : > { %v1609_v30 = vadd.f32 1e-06, %v1608_v29 }
 0x96f   : > { %3582 = vrcp.f32 %v1609_v30 }
 0x979   : > { %v3583_v33 = vpop.eup %3582 }
 0x97a   : > { %v1618_v35 = vmul.f32 %v3583_v33, %v1617_v32 }
 0x97c   : > { %v1625_v36 = vadd.f32 %v3082_v34, %v1618_v35 }
 0x97e   : > { %3303 = vmatmul.mubr.msk.f32.vlgmr.msra.gmra.mrb[14].mxu0 %vm704_vm2, %v1625_v36 }
 0x97f   : > { %3332 = vmatprep.mubr.msk.f32.mxu0 %vm3774_vm0, %v3773_v0  ;;  %3448 = vmatpush3.bf16.msra.mxu0 %v3447_v59 }
 0x980   : > { %3449 = vmatprep.subr.bf16.mxu0 %v3775_v19 }
 0x983   : > { %3451 = vmatpush3.bf16.msra.mxu0 %v3450_v61 }
 0x984   : > { %3335 = vmatprep.subr.mxu0 %v3773_v0 }
 0xa51   : > { %v1706_v41 = vpop.f32.mrb[14].mxu0 }
 0xa52   : > { %v1707_v42 = vadd.f32 %v3083_v40, %v1706_v41  ;;  %v3304_v43 = vpop.f32.mrb[15].mxu0 }
 0xa54   : > { %v1710_v44 = vmax.f32 %v1707_v42, 0.0 }
 0xa56   : > { %3322 = vmatmul.mubr.msk.f32.vlgmr.msra.gmra.mrb[8].mxu1 %vm1719_vm9, %v1710_v44 }
 0xa57   : > { %3347 = vmatprep.mubr.msk.f32.mxu1 %vm3774_vm0, %v3773_v0 }
 0xb29   : > { %v1789_v45 = vpop.f32.mrb[8].mxu1 }
 0xb2a   : > { %v1793_v47 = vadd.f32 %v1789_v45, %v4206_v63  ;;  %v3323_v48 = vpop.f32.mrb[9].mxu1 }
 0xb2c   : > { %v4273_v49 = vadd.f32 %v3086_v46, %v1793_v47 }
 0xb2e   : > { %v1806_v50 = vsel %vm704_vm2, %v4273_v49, 0.0 }
 0xb2f   : > { %1807 = vadd.xlane.f32.xlu0 %v1806_v50 }
 0xbbc   : > { %v1808_v51 = vpop.xlane.xlu0 %1807 }
 0xbbd   : > { %v1809_v52 = vmul.f32 0.03125, %v1808_v51 }
 0xbbf   : > { %v1810_v53 = vsub.f32 %v4273_v49, %v1809_v52 }
 0xbc1   : > { %v1811_v54 = vmul.f32 %v1810_v53, %v1810_v53  ;;  %v1831_v9 = vmul.f32 %v3089_v7, %v1810_v53 }
 0xbc3   : > { %v1812_v55 = vsel %vm704_vm2, %v1811_v54, 0.0 }
 0xbc4   : > { %1813 = vadd.xlane.f32.xlu1 %v1812_v55 }
 0xc51   : > { %v1814_v62 = vpop.xlane.xlu1 %1813 }
 0xc52   : > { %v1815_v63 = vmul.f32 0.032258064, %v1814_v62 }
 0xc54   : > { %3584 = vrsqrt.f32 %v1815_v63  ;;  %vm1818_vm10 = vcmp.eq.f32.partialorder %v1815_v63, inf  ;;  %v1821_v3 = vand.u32 2147483648, %v1815_v63  ;;  %vm1820_vm11 = vcmp.eq.f32.partialorder %v1815_v63, 0.0 }
 0xc5e   : > { %v3585_v1 = vpop.eup %3584 }
 0xc5f   : > { %v1817_v2 = vmul.f32 %v3585_v1, %v1815_v63 }
 0xc61   : > { %v1819_v4 = vsel %vm1818_vm10, %v1815_v63, %v1817_v2 }
 0xc62   : > { %v1822_v5 = vsel %vm1820_vm11, %v1821_v3, %v1819_v4 }
 0xc63   : > { %v1823_v6 = vadd.f32 1e-06, %v1822_v5 }
 0xc65   : > { %3586 = vrcp.f32 %v1823_v6 }
 0xc6f   : > { %v3587_v8 = vpop.eup %3586 }
 0xc70   : > { %v1832_v11 = vmul.f32 %v3587_v8, %v1831_v9 }
 0xc72   : > { %v1839_v12 = vadd.f32 %v3090_v10, %v1832_v11 }
 0xc74   : > { %3333 = vmatmul.mubr.msk.f32.vlgmr.msra.gmra.mrb[16].mxu0 %vm704_vm2, %v1839_v12 }
 0xc75   : > { %3337 = vmatprep.mubr.msk.f32.mxu0 %vm3774_vm0, %v3773_v0 }
 0xd47   : > { %v1922_v14 = vpop.f32.mrb[16].mxu0 }
 0xd48   : > { %v4305_v15 = vadd.f32 %v3096_v13, %v1922_v14  ;;  %v3334_v16 = vpop.f32.mrb[17].mxu0 }
 0xd49   : > { %v3111_v16 = vld [vmem:[%s4529_s8 + $0x28] sm:$0xff] }
 0xd4a   : > { %2093 = vrot.lane.b32.xlu1 %v4305_v15, %s4612_s21  ;;  %1927 = vrot.lane.b32.xlu0 %v4305_v15, %s4613_s11  ;;  %s4620_s21 = smov 48   ;;  %s4621_s11 = smov 40  }
 0xd4e   : > { %2091 = vrot.lane.b32.xlu1 %v4305_v15, %s4614_s16  ;;  %2259 = vrot.lane.b32.xlu0 %v4305_v15, %s4615_s22  ;;  %s4622_s16 = smov 56   ;;  %s4623_s22 = smov 8  }
 0xd52   : > { %2257 = vrot.lane.b32.xlu1 %v4305_v15, %s4616_s27  ;;  %2425 = vrot.lane.b32.xlu0 %v4305_v15, %s4617_s19  ;;  %s4624_s27 = smov 16   ;;  %s4625_s19 = smov 24  }
 0xd56   : > { %2423 = vrot.lane.b32.xlu1 %v4305_v15, %s4618_s10 }
 0xdbc   : > { %v2094_v17 = vpop.permute.xlu1 %2093  ;;  %v1928_v18 = vpop.permute.xlu0 %1927 }
 0xdbd   : > { %3336 = vmatpush3.xpose.msk.msra.mxu0 %vm625_vm1, %v1928_v18  ;;  %3346 = vmatpush3.xpose.msk.msra.mxu1 %vm625_vm1, %v2094_v17  ;;  %v3112_v18 = vld [vmem:[%s4529_s8 + $0x30] sm:$0xff] }
 0xdbe   : > { %3355 = vmatprep.subr.mxu1 %v3773_v0  ;;  %3340 = vmatprep.subr.mxu0 %v3773_v0 }
 0xdc0   : > { %v2092_v20 = vpop.permute.xlu1 %2091  ;;  %3338 = vmatmul.mubr.msk.f32.vlgmr.msra.gmra.mrb[18].mxu0 %vm625_vm1, %v4305_v15  ;;  %v2260_v21 = vpop.permute.xlu0 %2259 }
 0xdc1   : > { %3348 = vmatmul.mubr.msk.f32.vlgmr.msra.gmra.mrb[10].mxu1 %vm625_vm1, %v2092_v20  ;;  %3342 = vmatprep.mubr.msk.f32.mxu0 %vm3774_vm0, %v3773_v0  ;;  %v3113_v20 = vld [vmem:[%s4529_s8 + $0x38] sm:$0xff] }
 0xdc2   : > { %3356 = vmatpush3.xpose.msk.msra.mxu1 %vm625_vm1, %v2260_v21  ;;  %3357 = vmatprep.mubr.msk.f32.mxu1 %vm3774_vm0, %v3773_v0  ;;  %v3456_v21 = vpack.c.bf16 %v3113_v20, %v3112_v18 }
 0xdc3   : > { %3365 = vmatprep.subr.mxu1 %v3773_v0 }
 0xdc4   : > { %v2258_v22 = vpop.permute.xlu1 %2257  ;;  %v2426_v23 = vpop.permute.xlu0 %2425 }
 0xdc5   : > { %3358 = vmatmul.mubr.msk.f32.vlgmr.msra.gmra.mrb[12].mxu1 %vm625_vm1, %v2258_v22 }
 0xdc6   : > { %3366 = vmatpush3.xpose.msk.msra.mxu1 %vm625_vm1, %v2426_v23  ;;  %3367 = vmatprep.mubr.msk.f32.mxu1 %vm3774_vm0, %v3773_v0 }
 0xdc7   : > { %3452 = vmatprep.subr.bf16.mxu1 %v3775_v19 }
 0xdc8   : > { %v2424_v24 = vpop.permute.xlu1 %2423 }
 0xdc9   : > { %3368 = vmatmul.mubr.msk.f32.vlgmr.msra.gmra.mrb[14].mxu1 %vm625_vm1, %v2424_v24 }
 0xdca   : > { %3383 = vmatprep.mubr.msk.f32.mxu1 %vm3774_vm0, %v3773_v0 }
 0xe93   : > { %v1999_v25 = vpop.f32.mrb[18].mxu0 }
 0xe94   : > { %v2003_v26 = vmul.f32 0.35355338, %v1999_v25  ;;  %v3339_v27 = vpop.f32.mrb[19].mxu0  ;;  %v2165_v28 = vpop.f32.mrb[10].mxu1 }
 0xe95   : > { %v2169_v29 = vmul.f32 0.35355338, %v2165_v28  ;;  %v3349_v30 = vpop.f32.mrb[11].mxu1 }
 0xe96   : > { %v2004_v31 = vsel %vm625_vm1, %v2003_v26, -inf }
 0xe97   : > { %2005 = vmax.xlane.f32.xlu0 %v2004_v31  ;;  %v2170_v32 = vsel %vm625_vm1, %v2169_v29, -inf }
 0xe98   : > { %2171 = vmax.xlane.f32.xlu1 %v2170_v32  ;;  %v2331_v33 = vpop.f32.mrb[12].mxu1 }
 0xe99   : > { %v2335_v34 = vmul.f32 0.35355338, %v2331_v33  ;;  %v3359_v35 = vpop.f32.mrb[13].mxu1 }
 0xe9b   : > { %v2336_v36 = vsel %vm625_vm1, %v2335_v34, -inf }
 0xe9c   : > { %v2497_v37 = vpop.f32.mrb[14].mxu1  ;;  %2337 = vmax.xlane.f32.xlu0 %v2336_v36 }
 0xe9d   : > { %v2501_v38 = vmul.f32 0.35355338, %v2497_v37  ;;  %v3369_v39 = vpop.f32.mrb[15].mxu1  ;;  %v3116_v37 = vld [vmem:[%s4530_s9 + $0x1] ss:$0 sm:$0xff] }
 0xe9f   : > { %v2502_v40 = vsel %vm625_vm1, %v2501_v38, -inf }
 0xea0   : > { %2503 = vmax.xlane.f32.xlu0 %v2502_v40 }
 0xea9   : > { %2015 = vrot.lane.b32.xlu1 %v4305_v15, %s4619_s17  ;;  %s4626_s17 = sld [smem:[#allocation25_spill]] }
 0xf24   : > { %v2006_v41 = vpop.xlane.xlu0 %2005 }
 0xf25   : > { %v2007_v42 = vsub.f32 %v2003_v26, %v2006_v41  ;;  %v2172_v43 = vpop.xlane.xlu1 %2171 }
 0xf26   : > { %v2173_v44 = vsub.f32 %v2169_v29, %v2172_v43 }
 0xf27   : > { %v2008_v45 = vmul.f32 1.442695, %v2007_v42 }
 0xf28   : > { %v2174_v46 = vmul.f32 1.442695, %v2173_v44 }
 0xf29   : > { %3588 = vpow2.f32 %v2008_v45  ;;  %v2016_v47 = vpop.permute.xlu1 %2015  ;;  %v2338_v48 = vpop.xlane.xlu0 %2337 }
 0xf2a   : > { %3590 = vpow2.f32 %v2174_v46  ;;  %v2339_v50 = vsub.f32 %v2335_v34, %v2338_v48  ;;  %3341 = vmatpush3.msra.mxu0 %v2016_v47  ;;  %v3121_v46 = vld [vmem:[%s4533_s12 + $0x20] sm:$0xff]  ;;  %v3123_v47 = vld [vmem:[%s4533_s12 + $0x30] sm:$0xff] }
 0xf2b   : > { %3350 = vmatprep.subr.mxu0 %v3773_v0 }
 0xf2c   : > { %v2340_v51 = vmul.f32 1.442695, %v2339_v50  ;;  %v3124_v50 = vld [vmem:[%s4533_s12 + $0x38] sm:$0xff] }
 0xf2d   : > { %v2504_v52 = vpop.xlane.xlu0 %2503 }
 0xf2e   : > { %3592 = vpow2.f32 %v2340_v51  ;;  %v2505_v53 = vsub.f32 %v2501_v38, %v2504_v52  ;;  %v3462_v51 = vpack.c.bf16 %v3124_v50, %v3123_v47  ;;  %v3128_v52 = vld [vmem:[%s4535_s14 + $0x40] sm:$0xff] }
 0xf30   : > { %v2506_v54 = vmul.f32 1.442695, %v2505_v53  ;;  %v3129_v53 = vld [vmem:[%s4535_s14 + $0x48] sm:$0xff] }
 0xf32   : > { %3594 = vpow2.f32 %v2506_v54  ;;  %v3130_v54 = vld [vmem:[%s4535_s14 + $0x50] sm:$0xff] }
 0xf33   : > { %v3589_v55 = vpop.eup %3588 }
 0xf34   : > { %v3591_v56 = vpop.eup %3590  ;;  %v2010_v57 = vsel %vm625_vm1, %v3589_v55, 0.0 }
 0xf35   : > { %2011 = vadd.xlane.f32.xlu1 %v2010_v57  ;;  %v2176_v58 = vsel %vm625_vm1, %v3591_v56, 0.0 }
 0xf36   : > { %2177 = vadd.xlane.f32.xlu0 %v2176_v58  ;;  %v3132_v58 = vld [vmem:[%s4535_s14 + $0x60] sm:$0xff] }
 0xf38   : > { %v3593_v59 = vpop.eup %3592 }
 0xf39   : > { %v2342_v60 = vsel %vm625_vm1, %v3593_v59, 0.0 }
 0xf3a   : > { %2343 = vadd.xlane.f32.xlu1 %v2342_v60 }
 0xf3c   : > { %v3595_v61 = vpop.eup %3594 }
 0xf3d   : > { %v2508_v62 = vsel %vm625_vm1, %v3595_v61, 0.0 }
 0xf3e   : > { %2509 = vadd.xlane.f32.xlu0 %v2508_v62 }
 0xf4b   : > { %2347 = vrot.lane.b32.xlu1 %v4305_v15, %s4620_s21 }
 0xf4f   : > { %2513 = vrot.lane.b32.xlu1 %v4305_v15, %s4621_s11 }
 0xf54   : > { %2181 = vrot.lane.b32.xlu0 %v4305_v15, %s4622_s16  ;;  %v3110_v15 = vld [vmem:[%s4529_s8 + $0x20] sm:$0xff]  ;;  %s4627_s16 = sld [smem:[#allocation26_spill]] }
 0xf55   : > { %v3453_v17 = vpack.c.bf16 %v3111_v16, %v3110_v15 }
 0xf57   : > { %3454 = vmatpush3.bf16.msra.mxu1 %v3453_v17 }
 0xf58   : > { %3455 = vmatprep.subr.bf16.mxu1 %v3775_v19 }
 0xf5b   : > { %3457 = vmatpush3.bf16.msra.mxu1 %v3456_v21  ;;  %v3138_v21 = vld [vmem:[%s4611_s15 + $0x1] ss:$0 sm:$0xff] }
 0xf5c   : > { %3464 = vmatprep.subr.bf16.mxu1 %v3775_v19 }
 0xfc2   : > { %v2012_v63 = vpop.xlane.xlu1 %2011 }
 0xfc3   : > { %3596 = vrcp.f32 %v2012_v63  ;;  %v2178_v1 = vpop.xlane.xlu0 %2177 }
 0xfc4   : > { %3598 = vrcp.f32 %v2178_v1 }
 0xfc7   : > { %v2344_v2 = vpop.xlane.xlu1 %2343 }
 0xfc8   : > { %3600 = vrcp.f32 %v2344_v2 }
 0xfcb   : > { %v2510_v3 = vpop.xlane.xlu0 %2509  ;;  %v2348_v8 = vpop.permute.xlu1 %2347 }
 0xfcc   : > { %3602 = vrcp.f32 %v2510_v3 }
 0xfcd   : > { %v3597_v4 = vpop.eup %3596 }
 0xfce   : > { %v2014_v5 = vmul.f32 %v3597_v4, %v3589_v55  ;;  %v3599_v6 = vpop.eup %3598  ;;  %v3465_v55 = vpack.c.bf16 %v3129_v53, %v3128_v52 }
 0xfcf   : > { %v2182_v7 = vpop.permute.xlu0 %2181  ;;  %v2180_v9 = vmul.f32 %v3599_v6, %v3591_v56  ;;  %v2514_v13 = vpop.permute.xlu1 %2513  ;;  %v3131_v56 = vld [vmem:[%s4535_s14 + $0x58] sm:$0xff]  ;;  %v3119_v6 = vld [vmem:[%s4608_s1 + $0x1] ss:$0 sm:$0xff] }
 0xfd0   : > { %3343 = vmatmul.mubr.msk.f32.vlgmr.msra.gmra.mrb[20].mxu0 %vm625_vm1, %v2014_v5  ;;  %v3468_v57 = vpack.c.bf16 %v3131_v56, %v3130_v54 }
 0xfd1   : > { %3351 = vmatpush3.msra.mxu0 %v2182_v7  ;;  %3352 = vmatprep.mubr.msk.f32.mxu0 %vm3774_vm0, %v3773_v0 }
 0xfd2   : > { %3360 = vmatprep.subr.mxu0 %v3773_v0  ;;  %v3601_v10 = vpop.eup %3600 }
 0xfd3   : > { %v2346_v11 = vmul.f32 %v3601_v10, %v3593_v59  ;;  %v3133_v59 = vld [vmem:[%s4535_s14 + $0x68] sm:$0xff] }
 0xfd4   : > { %3353 = vmatmul.mubr.msk.f32.vlgmr.msra.gmra.mrb[22].mxu0 %vm625_vm1, %v2180_v9  ;;  %v3471_v60 = vpack.c.bf16 %v3133_v59, %v3132_v58 }
 0xfd5   : > { %3361 = vmatpush3.msra.mxu0 %v2348_v8  ;;  %3362 = vmatprep.mubr.msk.f32.mxu0 %vm3774_vm0, %v3773_v0 }
 0xfd6   : > { %3370 = vmatprep.subr.mxu0 %v3773_v0  ;;  %v3603_v12 = vpop.eup %3602 }
 0xfd7   : > { %v2512_v14 = vmul.f32 %v3603_v12, %v3595_v61  ;;  %v3135_v12 = vld [vmem:[%s4535_s14 + $0x78] sm:$0xff] }
 0xfd8   : > { %3363 = vmatmul.mubr.msk.f32.vlgmr.msra.gmra.mrb[24].mxu0 %vm625_vm1, %v2346_v11  ;;  %v3134_v11 = vld [vmem:[%s4535_s14 + $0x70] sm:$0xff] }
 0xfd9   : > { %3371 = vmatpush3.msra.mxu0 %v2514_v13  ;;  %3372 = vmatprep.mubr.msk.f32.mxu0 %vm3774_vm0, %v3773_v0  ;;  %v3474_v13 = vpack.c.bf16 %v3135_v12, %v3134_v11 }
 0xfda   : > { %3458 = vmatprep.subr.bf16.mxu0 %v3775_v19 }
 0xfdc   : > { %3373 = vmatmul.mubr.msk.f32.vlgmr.msra.gmra.mrb[26].mxu0 %vm625_vm1, %v2512_v14  ;;  %v3126_v14 = vld [vmem:[%s4610_s23 + $0x1] ss:$0 sm:$0xff] }
 0xfdd   : > { %3394 = vmatprep.mubr.msk.f32.mxu0 %vm3774_vm0, %v3773_v0 }
0x10a3   : > { %v2087_v22 = vpop.f32.mrb[20].mxu0 }
0x10a4   : > { %v3344_v23 = vpop.f32.mrb[21].mxu0 }
0x10a7   : > { %v2253_v24 = vpop.f32.mrb[22].mxu0 }
0x10a8   : > { %2590 = vrot.lane.b32.xlu0 %v2253_v24, %s4623_s22  ;;  %v3354_v25 = vpop.f32.mrb[23].mxu0  ;;  %s4628_s22 = sshll.u32 %s4051_s18, 3 }
0x10ab   : > { %v2419_v26 = vpop.f32.mrb[24].mxu0 }
0x10ac   : > { %2594 = vrot.lane.b32.xlu1 %v2419_v26, %s4624_s27  ;;  %v3364_v27 = vpop.f32.mrb[25].mxu0  ;;  %s615_s27 = scalar_lea.vmem [#allocation8], %s4628_s22 }
0x10ad   : > { %s2960_s1 = sshll.u32 %s615_s27, 4  ;;  %s4478_s1 = int_to_ptr.vmem [resolvable:$true] %s2960_s1 }
0x10ae   : > { %s3698_s10 = scalar_lea.vmem %s4478_s1, 128 }
0x10af   : > { %v2585_v28 = vpop.f32.mrb[26].mxu0  ;;  %p3699_p2 = scmp.ne.s32.totalorder %s4478_s1, %s3698_s10 }
0x10b0   : > { %2598 = vrot.lane.b32.xlu0 %v2585_v28, %s4625_s19  ;;  %v3374_v29 = vpop.f32.mrb[27].mxu0  ;;  %s2947_s19 = scalar_lea.sflag [#allocation4], %s4051_s18 }
0x10b1   : > { %p3700_p1 = pnand %p3699_p2, %p4005_p6 }
0x10b3   : > { %p3701_p4 = pneg %p3700_p1 }
0x111a   : > { %v2591_v30 = vpop.permute.xlu0 %2590 }
0x111b   : > { %v2601_v32 = vsel %vm625_vm1, %v2087_v22, %v2591_v30 }
0x111e   : > { %v2595_v31 = vpop.permute.xlu1 %2594 }
0x111f   : > { %v2602_v33 = vsel %vm1500_vm5, %v2601_v32, %v2595_v31 }
0x1122   : > { %v2599_v34 = vpop.permute.xlu0 %2598 }
0x1123   : > { %v2603_v35 = vsel %vm1502_vm6, %v2602_v33, %v2599_v34 }
0x1124   : > { %3384 = vmatmul.mubr.msk.f32.vlgmr.msra.gmra.mrb[16].mxu1 %vm704_vm2, %v2603_v35 }
0x1125   : > { %3413 = vmatprep.mubr.msk.f32.mxu1 %vm3774_vm0, %v3773_v0  ;;  %3466 = vmatpush3.bf16.msra.mxu1 %v3465_v55 }
0x1126   : > { %3467 = vmatprep.subr.bf16.mxu1 %v3775_v19 }
0x1129   : > { %3469 = vmatpush3.bf16.msra.mxu1 %v3468_v57 }
0x112a   : > { %3470 = vmatprep.subr.bf16.mxu1 %v3775_v19 }
0x112d   : > { %3472 = vmatpush3.bf16.msra.mxu1 %v3471_v60 }
0x112e   : > { %3473 = vmatprep.subr.bf16.mxu1 %v3775_v19 }
0x1131   : > { %3475 = vmatpush3.bf16.msra.mxu1 %v3474_v13 }
0x11f7   : > { %v2678_v36 = vpop.f32.mrb[16].mxu1 }
0x11f8   : > { %v2682_v38 = vadd.f32 %v2678_v36, %v4273_v49  ;;  %v3385_v39 = vpop.f32.mrb[17].mxu1  ;;  %v3122_v49 = vld [vmem:[%s4533_s12 + $0x28] sm:$0xff] }
0x11f9   : > { %v3459_v48 = vpack.c.bf16 %v3122_v49, %v3121_v46  ;;  %v3139_v39 = vld [vmem:[%s4626_s17] ss:$0 sm:$0xff]  ;;  %s3702_s17 = sshll.u32 %s3790_s0, 4  ;;  %s3703_s17 = int_to_ptr.vmem [resolvable:$false] %s3702_s17 }
0x11fa   : > { %v4401_v40 = vadd.f32 %v3116_v37, %v2682_v38  ;;  %s3704_s21 = scalar_lea.vmem %s3703_s17, 256  ;;  %p3705_p8 = scmp.lt.s32.totalorder %s4478_s1, %s3703_s17 }
0x11fb   : > { %3460 = vmatpush3.bf16.msra.mxu0 %v3459_v48  ;;  %p3706_p12 = scmp.lt.s32.totalorder %s3704_s21, %s3698_s10 }
0x11fc   : > { %v2696_v41 = vsel %vm704_vm2, %v4401_v40, 0.0  ;;  %3461 = vmatprep.subr.bf16.mxu0 %v3775_v19  ;;  %v3120_v19 = vld [vmem:[%s4609_s2 + $0x1] ss:$0 sm:$0xff] }
0x11fd   : > { %2697 = vadd.xlane.f32.xlu1 %v2696_v41  ;;  %p3707_p3 = por %p3706_p12, %p3705_p8 }
0x11ff   : > { %3463 = vmatpush3.bf16.msra.mxu0 %v3462_v51  ;;  %p3708_p7 = pnand %p3707_p3, %p3701_p4 }
0x128a   : > { %v2698_v42 = vpop.xlane.xlu1 %2697 }
0x128b   : > { %v2699_v43 = vmul.f32 0.03125, %v2698_v42  ;;  %v3140_v42 = vld [vmem:[%s4627_s16] ss:$0 sm:$0xff] }
0x128d   : > { %v2700_v44 = vsub.f32 %v4401_v40, %v2699_v43 }
0x128f   : > { %v2701_v45 = vmul.f32 %v2700_v44, %v2700_v44  ;;  %v2721_v7 = vmul.f32 %v3119_v6, %v2700_v44 }
0x1291   : > { %v2702_v0 = vsel %vm704_vm2, %v2701_v45, 0.0 }
0x1292   : > { %2703 = vadd.xlane.f32.xlu0 %v2702_v0 }
0x131f   : > { %v2704_v61 = vpop.xlane.xlu0 %2703 }
0x1320   : > { %v2705_v62 = vmul.f32 0.032258064, %v2704_v61 }
0x1322   : > { %3604 = vrsqrt.f32 %v2705_v62  ;;  %vm2708_vm12 = vcmp.eq.f32.partialorder %v2705_v62, inf  ;;  %v2711_v2 = vand.u32 2147483648, %v2705_v62  ;;  %vm2710_vm13 = vcmp.eq.f32.partialorder %v2705_v62, 0.0 }
0x132c   : > { %v3605_v63 = vpop.eup %3604 }
0x132d   : > { %v2707_v1 = vmul.f32 %v3605_v63, %v2705_v62 }
0x132f   : > { %v2709_v3 = vsel %vm2708_vm12, %v2705_v62, %v2707_v1 }
0x1330   : > { %v2712_v4 = vsel %vm2710_vm13, %v2711_v2, %v2709_v3 }
0x1331   : > { %v2713_v5 = vadd.f32 1e-06, %v2712_v4 }
0x1333   : > { %3606 = vrcp.f32 %v2713_v5 }
0x133d   : > { %v3607_v9 = vpop.eup %3606 }
0x133e   : > { %v2722_v8 = vmul.f32 %v3607_v9, %v2721_v7 }
0x1340   : > { %v2729_v10 = vadd.f32 %v3120_v19, %v2722_v8 }
0x1342   : > { %3395 = vmatmul.mubr.msk.f32.vlgmr.msra.gmra.mrb[28].mxu0 %vm704_vm2, %v2729_v10 }
0x1415   : > { %v2812_v15 = vpop.f32.mrb[28].mxu0 }
0x1416   : > { %v2813_v16 = vadd.f32 %v3126_v14, %v2812_v15  ;;  %v3396_v17 = vpop.f32.mrb[29].mxu0 }
0x1418   : > { %v2816_v18 = vmax.f32 %v2813_v16, 0.0 }
0x141a   : > { %3414 = vmatmul.mubr.msk.f32.vlgmr.msra.gmra.mrb[18].mxu1 %vm1719_vm9, %v2816_v18 }
0x14ed   : > { %v2895_v20 = vpop.f32.mrb[18].mxu1 }
0x14ee   : > { %v2899_v22 = vadd.f32 %v2895_v20, %v4401_v40  ;;  %v3415_v23 = vpop.f32.mrb[19].mxu1 }
0x14f0   : > { %v2908_v24 = vadd.f32 %v3138_v21, %v2899_v22 }
0x14f2   : > { %v2911_v25 = vsel %vm704_vm2, %v2908_v24, 0.0 }
0x14f3   : > { %2912 = vadd.xlane.f32.xlu0 %v2911_v25 }
0x1580   : > { %v2913_v26 = vpop.xlane.xlu0 %2912 }
0x1581   : > { %v2914_v27 = vmul.f32 0.03125, %v2913_v26 }
0x1583   : > { %v2915_v28 = vsub.f32 %v2908_v24, %v2914_v27 }
0x1585   : > { %v2916_v29 = vmul.f32 %v2915_v28, %v2915_v28  ;;  %v2936_v40 = vmul.f32 %v3139_v39, %v2915_v28 }
0x1587   : > { %v2917_v30 = vsel %vm704_vm2, %v2916_v29, 0.0 }
0x1588   : > { %2918 = vadd.xlane.f32.xlu1 %v2917_v30 }
0x1615   : > { %v2919_v31 = vpop.xlane.xlu1 %2918 }
0x1616   : > { %v2920_v32 = vmul.f32 0.032258064, %v2919_v31 }
0x1618   : > { %3608 = vrsqrt.f32 %v2920_v32  ;;  %vm2923_vm14 = vcmp.eq.f32.partialorder %v2920_v32, inf  ;;  %v2926_v35 = vand.u32 2147483648, %v2920_v32  ;;  %vm2925_vm15 = vcmp.eq.f32.partialorder %v2920_v32, 0.0 }
0x1622   : > { %v3609_v33 = vpop.eup %3608 }
0x1623   : > { %v2922_v34 = vmul.f32 %v3609_v33, %v2920_v32 }
0x1625   : > { %v2924_v36 = vsel %vm2923_vm14, %v2920_v32, %v2922_v34 }
0x1626   : > { %v2927_v37 = vsel %vm2925_vm15, %v2926_v35, %v2924_v36 }
0x1627   : > { %v2928_v38 = vadd.f32 1e-06, %v2927_v37 }
0x1629   : > { %3610 = vrcp.f32 %v2928_v38 }
0x1633   : > { %v3611_v41 = vpop.eup %3610 }
0x1634   : > { %v2937_v43 = vmul.f32 %v3611_v41, %v2936_v40 }
0x1636   : > { %v2944_v44 = vadd.f32 %v3140_v42, %v2937_v43 }
0x1638   : > { %2945 = vst.msk [vmem:[%s615_s27] sm:$0xff] %vm704_vm2, %v2944_v44 }
0x1639   : > { %3711 = shalt.err (!%p3708_p7)
}
0x163a   : > { %s3712_s4 = scalar_lea.hbm %s4476_s6, 128  ;;  %s3716_s11 = scalar_lea.hbm %s4629_s5, 256 }
0x163b   : > { %p3713_p10 = scmp.ne.s32.totalorder %s4476_s6, %s3712_s4  ;;  %p3717_p0 = scmp.lt.u32.totalorder %s4476_s6, %s4629_s5 }
0x163c   : > { %p3718_p11 = scmp.lt.u32.totalorder %s3716_s11, %s3712_s4  ;;  %p3720_p2 = scmp.lt.u32.totalorder %s3712_s4, %s4476_s6 }
0x163d   : > { %p3714_p13 = pnand %p3713_p10, %p4005_p6 }
0x163e   : > { %p3719_p9 = por %p3718_p11, %p3717_p0 }
0x163f   : > { %p3715_p5 = pneg %p3714_p13 }
0x1640   : > { %p3721_p1 = por %p3720_p2, %p3719_p9 }
0x1642   : > { %p3722_p4 = pnand %p3721_p1, %p3715_p5 }
0x1644   : > { %3725 = shalt.err (!%p3722_p4)
}
0x1645   : > { %3486 = dma.vmem_to_hbm [thread:$0]  (%p4005_p6), %s4478_s1, 128, %s4476_s6, %s2947_s19  }
0x1646 PF: > { %s4630_s22 = sld [smem:[#allocation12_spill]]  ;;  %s4631_s27 = sld [smem:[#allocation13_spill]] }
0x1647   : > { %p4633_p12 = scmp.ge.s32.totalorder %s3768_s30, 2 }
0x164c   : > { %s2972_s10 = sand.u32 1, %s4630_s22   ;;  %p4632_p8 = scmp.ne.s32.totalorder %s4631_s27, 0 }
0x164d   : > { %s2973_s0 = scalar_lea.sflag [#allocation4], %s2972_s10 }
0x164e   : > { %p3500_p3 = pnand %p4633_p12, %p4632_p8 }
0x1650   : > { %3751 = dma.done.wait (!%p3500_p3), %s2973_s0, 128  }
0x1651   : > { %3753 = vsyncadd (!%p3500_p3), %s2973_s0, 4294967168  ;;  %p32_p7 = scmp.ge.s32.totalorder %s3942_s26, 4   ;;  %s4634_s27 = smov %s3760_s28 }
0x1652   : > { %s4635_s28 = smov %s3764_s29  ;;  %s4636_s29 = smov %s4001_s25 }
0x1653   : > { %s4637_s30 = smov %s3942_s26  ;;  %34 = sbr.rel (!%p32_p7) target bundleno = 21 (0x15), region = 157 }
0x165a   :  { %2978 = vsyncpa [#allocation3], 1 }
0x165b   :  { %2980 = vsyncpa [#allocation3 + $0x1], 1 }
0x165c   :  { %2981 = vsyncpa [#allocation6], 1 }
0x165d   :  { %2982 = vsyncpa [#allocation4], 1 }
0x165e   :  { %2984 = vsyncpa [#allocation4 + $0x1], 1 }

</bundles_post_ra>
